<compile_context>
chip_gen: v6e
topology: v6e:2x2x1
jax: 0.10.0
libtpu: 0.0.40
codegen_flags: <defaults>
</compile_context>

<pallas_src>
import functools

import jax
import jax.numpy as jnp
from jax.experimental import pallas as pl
from jax.experimental.pallas import tpu as pltpu


def _dsconv_fused_kernel(xp_ref, wf_ref, b_ref, o_ref, *, tile_h, compute_dtype):
    # xp_ref: (1, Hp, Wp, C)    reflect-padded NHWC input (resident across h tiles)
    # wf_ref: (9, C, NOUT)      fused depthwise*pointwise per-tap weights
    # b_ref : (1, NOUT)         fused bias (pw_b + dw_b @ pw)
    # o_ref : (1, NOUT, TH*W)   channel-major, lane-dense output tile
    Wp = xp_ref.shape[2]
    W = Wp - 2
    NOUT = o_ref.shape[1]
    TH = tile_h
    THW = TH * W

    h = pl.program_id(1)
    row0 = pl.multiple_of(h * TH, TH)

    # Rows [row0, row0 + TH + 2) of the padded image feed this output tile
    # (1-row halo on each side).  Single dynamic-sliced load from VMEM.
    x_tile = xp_ref[0, pl.ds(row0, TH + 2), :, :].astype(jnp.float32)  # (TH+2, Wp, C)

    wf = wf_ref[...].astype(compute_dtype)  # (9, C, NOUT)

    # Fused depthwise + pointwise: y(THW, NOUT) += Xs_tap(THW, C) @ Wf[tap].
    # 9 small matmuls on the MXU, accumulated in f32; no (H, W, CK) intermediate.
    acc = None
    for dy in range(3):
        for dx in range(3):
            tap = dy * 3 + dx
            xs = x_tile[dy:dy + TH, dx:dx + W, :].reshape(THW, -1)
            p = jnp.dot(xs.astype(compute_dtype), wf[tap],
                        preferred_element_type=jnp.float32)  # (THW, NOUT)
            acc = p if acc is None else acc + p

    acc = acc + b_ref[0, :].astype(jnp.float32)[None, :]

    # One small transpose (THW, NOUT) -> (NOUT, THW): makes the HBM store
    # lane-dense and the output directly NCHW-layout (no wrapper transpose).
    o_ref[0] = acc.T.astype(o_ref.dtype)


def _pick_tile_h(H, W):
    """Largest-M lane-dense tile: smallest TH | H with (TH*W) % 128 == 0 and
    TH*W >= 256; otherwise the smallest lane-dense TH; otherwise the full H
    (full-dim blocks are exempt from the (8,128) rule)."""
    best = None
    for th in range(1, H + 1):
        if H % th:
            continue
        if (th * W) % 128 == 0:
            if best is None:
                best = th
            if th * W >= 256:
                return th
    return best if best is not None else H


def dsconv2d_pallas(x, dw_w, dw_b, pw_w, pw_b, kernels_per_layer,
                    compute_dtype=jnp.float32):
    """x: (N, C, H, W) NCHW. Returns (N, NOUT, H, W) NCHW."""
    N, C, H, W = x.shape
    K = kernels_per_layer
    CK = C * K
    NOUT = pw_w.shape[0]
    assert H >= 2 and W >= 2, "reflect padding requires H, W >= 2"
    assert dw_w.shape == (CK, 1, 3, 3)
    assert pw_w.shape[:2] == (NOUT, CK)

    # ---- wrapper glue (no K-fold channel replication) -----------------------
    # NCHW -> NHWC so channels land on the lane / contraction axis, then reflect
    # pad the spatial dims by 1.
    x_nhwc = jnp.transpose(x, (0, 2, 3, 1))
    xp = jnp.pad(x_nhwc, ((0, 0), (1, 1), (1, 1), (0, 0)), mode="reflect")
    Hp, Wp = H + 2, W + 2

    # Fuse depthwise & pointwise weights and fold the depthwise bias into the
    # pointwise bias (f32 precompute, done once).
    dw_t = dw_w.reshape(C, K, 9).astype(jnp.float32)        # (C, K, 9)
    pw2 = pw_w.reshape(NOUT, C, K).astype(jnp.float32)      # (NOUT, C, K)
    wf = jnp.einsum("ckt,ock->tco", dw_t, pw2)              # (9, C, NOUT)
    b_eff = (pw_b.astype(jnp.float32) +
             pw_w.reshape(NOUT, CK).astype(jnp.float32) @ dw_b.astype(jnp.float32)
             ).reshape(1, NOUT)

    # ---- spatial tiling ------------------------------------------------------
    tile_h = _pick_tile_h(H, W)
    num_h_tiles = H // tile_h
    thw = tile_h * W

    kernel = functools.partial(_dsconv_fused_kernel,
                               tile_h=tile_h, compute_dtype=compute_dtype)

    flops = 2 * N * H * W * 9 * C * NOUT
    bytes_accessed = int(xp.size * 4 + N * NOUT * H * W * x.dtype.itemsize
                         + wf.size * 4 + b_eff.size * 4)

    out_flat = pl.pallas_call(
        kernel,
        out_shape=jax.ShapeDtypeStruct((N, NOUT, H * W), x.dtype),
        grid_spec=pltpu.PrefetchScalarGridSpec(
            num_scalar_prefetch=0,
            grid=(N, num_h_tiles),
            in_specs=[
                # Padded image: resident across the h axis, pipelined across n.
                pl.BlockSpec((1, Hp, Wp, C), lambda n, h: (n, 0, 0, 0)),
                pl.BlockSpec((9, C, NOUT), lambda n, h: (0, 0, 0)),
                pl.BlockSpec((1, NOUT), lambda n, h: (0, 0)),
            ],
            # Lane-dense, channel-major output tile (NOUT sublanes, TH*W lanes).
            out_specs=pl.BlockSpec((1, NOUT, thw), lambda n, h: (n, 0, h)),
        ),
        compiler_params=pltpu.CompilerParams(
            dimension_semantics=("parallel", "parallel"),
            vmem_limit_bytes=32 * 1024 * 1024,
        ),
        cost_estimate=pl.CostEstimate(flops=flops, transcendentals=0,
                                      bytes_accessed=bytes_accessed),
    )(xp, wf, b_eff)

    # (N, NOUT, H*W) is already NCHW memory order; reshape is free.
    return out_flat.reshape(N, NOUT, H, W)


def dsconv2d_ref(x, dw_w, dw_b, pw_w, pw_b):
    """Pure-JAX reference mirroring the PyTorch module (for verification)."""
    xp = jnp.pad(x, ((0, 0), (0, 0), (1, 1), (1, 1)), mode="reflect")
    dn = ("NCHW", "OIHW", "NCHW")
    y = jax.lax.conv_general_dilated(
        xp, dw_w, (1, 1), "VALID", dimension_numbers=dn,
        feature_group_count=x.shape[1])
    y = y + dw_b[None, :, None, None]
    z = jax.lax.conv_general_dilated(
        y, pw_w, (1, 1), "VALID", dimension_numbers=dn)
    z = z + pw_b[None, :, None, None]
    return z


def _run_case(N, NIN, H, W, K, NOUT, compute_dtype, rtol, atol):
    key = jax.random.PRNGKey(0)
    kx, k1, k2, k3, k4 = jax.random.split(key, 5)
    CK = NIN * K
    x = jax.random.normal(kx, (N, NIN, H, W), dtype=jnp.float32)
    dw_w = 0.1 * jax.random.normal(k1, (CK, 1, 3, 3), dtype=jnp.float32)
    dw_b = 0.1 * jax.random.normal(k2, (CK,), dtype=jnp.float32)
    pw_w = 0.1 * jax.random.normal(k3, (NOUT, CK, 1, 1), dtype=jnp.float32)
    pw_b = 0.1 * jax.random.normal(k4, (NOUT,), dtype=jnp.float32)

    out = jax.block_until_ready(
        dsconv2d_pallas(x, dw_w, dw_b, pw_w, pw_b, K, compute_dtype=compute_dtype))
    ref = jax.block_until_ready(dsconv2d_ref(x, dw_w, dw_b, pw_w, pw_b))

    assert out.shape == (N, NOUT, H, W), (out.shape, (N, NOUT, H, W))
    assert jnp.allclose(out, ref, rtol=rtol, atol=atol), (
        f"mismatch vs reference (max abs err "
        f"{float(jnp.max(jnp.abs(out - ref))):.3e})")


if __name__ == "__main__":
    # Primary check (matches the original module test): f32 MXU path, tight tol.
    _run_case(N=2, NIN=4, H=16, W=16, K=2, NOUT=8,
              compute_dtype=jnp.float32, rtol=1e-4, atol=1e-4)
    # Secondary check: spatially tiled (4 H-tiles of 8 rows) + bf16 MXU feed
    # (v5e/v6e/v7x), accumulation in f32, looser tolerance for bf16 operands.
    _run_case(N=2, NIN=4, H=32, W=32, K=2, NOUT=8,
              compute_dtype=jnp.bfloat16, rtol=2e-2, atol=2e-2)
    print("KERNEL_OK")
</pallas_src>

<mosaic_0001>
module attributes {stable_mosaic.version = 11 : i64} {
  func.func @_dsconv_fused_kernel(%arg0: i32, %arg1: i32, %arg2: memref<1x18x18x4xf32, #tpu.memory_space<vmem>>, %arg3: memref<9x4x8xf32, #tpu.memory_space<vmem>>, %arg4: memref<1x8xf32, #tpu.memory_space<vmem>>, %arg5: memref<1x8x256xf32, #tpu.memory_space<vmem>>) attributes {dimension_semantics = [#tpu.dimension_semantics<parallel>, #tpu.dimension_semantics<parallel>], iteration_bounds = array<i64: 2, 1>, scalar_prefetch = 0 : i64, scratch_operands = 0 : i64, tpu.core_type = #tpu.core_type<tc>, window_params = [{transform_indices = @transform_0, window_bounds = array<i64: 1, 18, 18, 4>}, {pipeline_mode = #tpu.pipeline_mode<synchronous>, transform_indices = @transform_1, window_bounds = array<i64: 9, 4, 8>}, {pipeline_mode = #tpu.pipeline_mode<synchronous>, transform_indices = @transform_2, window_bounds = array<i64: 1, 8>}, {transform_indices = @transform_3, window_bounds = array<i64: 1, 8, 256>}]} {
    %c16_i32 = arith.constant 16 : i32
    %0 = arith.muli %arg1, %c16_i32 : i32
    %1 = tpu.assume_multiple %0, 16 : i32
    %c0 = arith.constant 0 : index
    %2 = arith.index_cast %1 : i32 to index
    %c0_0 = arith.constant 0 : index
    %c0_1 = arith.constant 0 : index
    %3 = vector.load %arg2[%c0, %2, %c0_0, %c0_1] : memref<1x18x18x4xf32, #tpu.memory_space<vmem>>, vector<1x18x18x4xf32>
    %4 = vector.shape_cast %3 : vector<1x18x18x4xf32> to vector<18x18x4xf32>
    %c0_2 = arith.constant 0 : index
    %c0_3 = arith.constant 0 : index
    %c0_4 = arith.constant 0 : index
    %5 = vector.load %arg3[%c0_2, %c0_3, %c0_4] : memref<9x4x8xf32, #tpu.memory_space<vmem>>, vector<9x4x8xf32>
    %6 = vector.extract_strided_slice %4 {offsets = [0, 0, 0], sizes = [16, 16, 4], strides = [1, 1, 1]} : vector<18x18x4xf32> to vector<16x16x4xf32>
    %7 = vector.shape_cast %6 : vector<16x16x4xf32> to vector<256x4xf32>
    %8 = vector.extract_strided_slice %5 {offsets = [0, 0, 0], sizes = [1, 4, 8], strides = [1, 1, 1]} : vector<9x4x8xf32> to vector<1x4x8xf32>
    %9 = vector.shape_cast %8 : vector<1x4x8xf32> to vector<4x8xf32>
    %cst = arith.constant dense<0.000000e+00> : vector<256x8xf32>
    %10 = tpu.matmul %7, %9, %cst {dimension_numbers = #tpu.dot_dimension_numbers<[1], [0], [0], [1], [0, 0, 1, 1], [], []>} : vector<256x4xf32>, vector<4x8xf32>, vector<256x8xf32> -> vector<256x8xf32>
    %11 = vector.extract_strided_slice %4 {offsets = [0, 1, 0], sizes = [16, 16, 4], strides = [1, 1, 1]} : vector<18x18x4xf32> to vector<16x16x4xf32>
    %12 = vector.shape_cast %11 : vector<16x16x4xf32> to vector<256x4xf32>
    %13 = vector.extract_strided_slice %5 {offsets = [1, 0, 0], sizes = [1, 4, 8], strides = [1, 1, 1]} : vector<9x4x8xf32> to vector<1x4x8xf32>
    %14 = vector.shape_cast %13 : vector<1x4x8xf32> to vector<4x8xf32>
    %cst_5 = arith.constant dense<0.000000e+00> : vector<256x8xf32>
    %15 = tpu.matmul %12, %14, %cst_5 {dimension_numbers = #tpu.dot_dimension_numbers<[1], [0], [0], [1], [0, 0, 1, 1], [], []>} : vector<256x4xf32>, vector<4x8xf32>, vector<256x8xf32> -> vector<256x8xf32>
    %16 = arith.addf %10, %15 : vector<256x8xf32>
    %17 = vector.extract_strided_slice %4 {offsets = [0, 2, 0], sizes = [16, 16, 4], strides = [1, 1, 1]} : vector<18x18x4xf32> to vector<16x16x4xf32>
    %18 = vector.shape_cast %17 : vector<16x16x4xf32> to vector<256x4xf32>
    %19 = vector.extract_strided_slice %5 {offsets = [2, 0, 0], sizes = [1, 4, 8], strides = [1, 1, 1]} : vector<9x4x8xf32> to vector<1x4x8xf32>
    %20 = vector.shape_cast %19 : vector<1x4x8xf32> to vector<4x8xf32>
    %cst_6 = arith.constant dense<0.000000e+00> : vector<256x8xf32>
    %21 = tpu.matmul %18, %20, %cst_6 {dimension_numbers = #tpu.dot_dimension_numbers<[1], [0], [0], [1], [0, 0, 1, 1], [], []>} : vector<256x4xf32>, vector<4x8xf32>, vector<256x8xf32> -> vector<256x8xf32>
    %22 = arith.addf %16, %21 : vector<256x8xf32>
    %23 = vector.extract_strided_slice %4 {offsets = [1, 0, 0], sizes = [16, 16, 4], strides = [1, 1, 1]} : vector<18x18x4xf32> to vector<16x16x4xf32>
    %24 = vector.shape_cast %23 : vector<16x16x4xf32> to vector<256x4xf32>
    %25 = vector.extract_strided_slice %5 {offsets = [3, 0, 0], sizes = [1, 4, 8], strides = [1, 1, 1]} : vector<9x4x8xf32> to vector<1x4x8xf32>
    %26 = vector.shape_cast %25 : vector<1x4x8xf32> to vector<4x8xf32>
    %cst_7 = arith.constant dense<0.000000e+00> : vector<256x8xf32>
    %27 = tpu.matmul %24, %26, %cst_7 {dimension_numbers = #tpu.dot_dimension_numbers<[1], [0], [0], [1], [0, 0, 1, 1], [], []>} : vector<256x4xf32>, vector<4x8xf32>, vector<256x8xf32> -> vector<256x8xf32>
    %28 = arith.addf %22, %27 : vector<256x8xf32>
    %29 = vector.extract_strided_slice %4 {offsets = [1, 1, 0], sizes = [16, 16, 4], strides = [1, 1, 1]} : vector<18x18x4xf32> to vector<16x16x4xf32>
    %30 = vector.shape_cast %29 : vector<16x16x4xf32> to vector<256x4xf32>
    %31 = vector.extract_strided_slice %5 {offsets = [4, 0, 0], sizes = [1, 4, 8], strides = [1, 1, 1]} : vector<9x4x8xf32> to vector<1x4x8xf32>
    %32 = vector.shape_cast %31 : vector<1x4x8xf32> to vector<4x8xf32>
    %cst_8 = arith.constant dense<0.000000e+00> : vector<256x8xf32>
    %33 = tpu.matmul %30, %32, %cst_8 {dimension_numbers = #tpu.dot_dimension_numbers<[1], [0], [0], [1], [0, 0, 1, 1], [], []>} : vector<256x4xf32>, vector<4x8xf32>, vector<256x8xf32> -> vector<256x8xf32>
    %34 = arith.addf %28, %33 : vector<256x8xf32>
    %35 = vector.extract_strided_slice %4 {offsets = [1, 2, 0], sizes = [16, 16, 4], strides = [1, 1, 1]} : vector<18x18x4xf32> to vector<16x16x4xf32>
    %36 = vector.shape_cast %35 : vector<16x16x4xf32> to vector<256x4xf32>
    %37 = vector.extract_strided_slice %5 {offsets = [5, 0, 0], sizes = [1, 4, 8], strides = [1, 1, 1]} : vector<9x4x8xf32> to vector<1x4x8xf32>
    %38 = vector.shape_cast %37 : vector<1x4x8xf32> to vector<4x8xf32>
    %cst_9 = arith.constant dense<0.000000e+00> : vector<256x8xf32>
    %39 = tpu.matmul %36, %38, %cst_9 {dimension_numbers = #tpu.dot_dimension_numbers<[1], [0], [0], [1], [0, 0, 1, 1], [], []>} : vector<256x4xf32>, vector<4x8xf32>, vector<256x8xf32> -> vector<256x8xf32>
    %40 = arith.addf %34, %39 : vector<256x8xf32>
    %41 = vector.extract_strided_slice %4 {offsets = [2, 0, 0], sizes = [16, 16, 4], strides = [1, 1, 1]} : vector<18x18x4xf32> to vector<16x16x4xf32>
    %42 = vector.shape_cast %41 : vector<16x16x4xf32> to vector<256x4xf32>
    %43 = vector.extract_strided_slice %5 {offsets = [6, 0, 0], sizes = [1, 4, 8], strides = [1, 1, 1]} : vector<9x4x8xf32> to vector<1x4x8xf32>
    %44 = vector.shape_cast %43 : vector<1x4x8xf32> to vector<4x8xf32>
    %cst_10 = arith.constant dense<0.000000e+00> : vector<256x8xf32>
    %45 = tpu.matmul %42, %44, %cst_10 {dimension_numbers = #tpu.dot_dimension_numbers<[1], [0], [0], [1], [0, 0, 1, 1], [], []>} : vector<256x4xf32>, vector<4x8xf32>, vector<256x8xf32> -> vector<256x8xf32>
    %46 = arith.addf %40, %45 : vector<256x8xf32>
    %47 = vector.extract_strided_slice %4 {offsets = [2, 1, 0], sizes = [16, 16, 4], strides = [1, 1, 1]} : vector<18x18x4xf32> to vector<16x16x4xf32>
    %48 = vector.shape_cast %47 : vector<16x16x4xf32> to vector<256x4xf32>
    %49 = vector.extract_strided_slice %5 {offsets = [7, 0, 0], sizes = [1, 4, 8], strides = [1, 1, 1]} : vector<9x4x8xf32> to vector<1x4x8xf32>
    %50 = vector.shape_cast %49 : vector<1x4x8xf32> to vector<4x8xf32>
    %cst_11 = arith.constant dense<0.000000e+00> : vector<256x8xf32>
    %51 = tpu.matmul %48, %50, %cst_11 {dimension_numbers = #tpu.dot_dimension_numbers<[1], [0], [0], [1], [0, 0, 1, 1], [], []>} : vector<256x4xf32>, vector<4x8xf32>, vector<256x8xf32> -> vector<256x8xf32>
    %52 = arith.addf %46, %51 : vector<256x8xf32>
    %53 = vector.extract_strided_slice %4 {offsets = [2, 2, 0], sizes = [16, 16, 4], strides = [1, 1, 1]} : vector<18x18x4xf32> to vector<16x16x4xf32>
    %54 = vector.shape_cast %53 : vector<16x16x4xf32> to vector<256x4xf32>
    %55 = vector.extract_strided_slice %5 {offsets = [8, 0, 0], sizes = [1, 4, 8], strides = [1, 1, 1]} : vector<9x4x8xf32> to vector<1x4x8xf32>
    %56 = vector.shape_cast %55 : vector<1x4x8xf32> to vector<4x8xf32>
    %cst_12 = arith.constant dense<0.000000e+00> : vector<256x8xf32>
    %57 = tpu.matmul %54, %56, %cst_12 {dimension_numbers = #tpu.dot_dimension_numbers<[1], [0], [0], [1], [0, 0, 1, 1], [], []>} : vector<256x4xf32>, vector<4x8xf32>, vector<256x8xf32> -> vector<256x8xf32>
    %58 = arith.addf %52, %57 : vector<256x8xf32>
    %c0_13 = arith.constant 0 : index
    %c0_14 = arith.constant 0 : index
    %59 = vector.load %arg4[%c0_13, %c0_14] : memref<1x8xf32, #tpu.memory_space<vmem>>, vector<1x8xf32>
    %60 = vector.shape_cast %59 : vector<1x8xf32> to vector<8xf32>
    %61 = vector.shape_cast %60 : vector<8xf32> to vector<1x8xf32>
    %62 = vector.broadcast %61 : vector<1x8xf32> to vector<256x8xf32>
    %63 = arith.addf %58, %62 : vector<256x8xf32>
    %64 = tpu.transpose %63, [1, 0] : vector<256x8xf32> -> vector<8x256xf32>
    %c0_15 = arith.constant 0 : index
    %c0_16 = arith.constant 0 : index
    %c0_17 = arith.constant 0 : index
    %65 = vector.load %arg5[%c0_15, %c0_16, %c0_17] : memref<1x8x256xf32, #tpu.memory_space<vmem>>, vector<1x8x256xf32>
    %66 = vector.shape_cast %65 : vector<1x8x256xf32> to vector<8x256xf32>
    %67 = vector.shape_cast %64 : vector<8x256xf32> to vector<1x8x256xf32>
    tpu.vector_store %arg5[%c0_15, %c0_16, %c0_17], %67 {strides = array<i32>} : memref<1x8x256xf32, #tpu.memory_space<vmem>>, vector<1x8x256xf32>,
    return
  }
  func.func @transform_0(%arg0: i32, %arg1: i32) -> (i32, i32, i32, i32) {
    %c0_i32 = arith.constant 0 : i32
    %c0_i32_0 = arith.constant 0 : i32
    %c0_i32_1 = arith.constant 0 : i32
    %c0_i32_2 = arith.constant 0 : i32
    return %arg0, %c0_i32, %c0_i32_0, %c0_i32_1 : i32, i32, i32, i32
  }
  func.func @transform_1(%arg0: i32, %arg1: i32) -> (i32, i32, i32) {
    %c0_i32 = arith.constant 0 : i32
    %c0_i32_0 = arith.constant 0 : i32
    %c0_i32_1 = arith.constant 0 : i32
    %c0_i32_2 = arith.constant 0 : i32
    return %c0_i32, %c0_i32_0, %c0_i32_1 : i32, i32, i32
  }
  func.func @transform_2(%arg0: i32, %arg1: i32) -> (i32, i32) {
    %c0_i32 = arith.constant 0 : i32
    %c0_i32_0 = arith.constant 0 : i32
    %c0_i32_1 = arith.constant 0 : i32
    return %c0_i32, %c0_i32_0 : i32, i32
  }
  func.func @transform_3(%arg0: i32, %arg1: i32) -> (i32, i32, i32) {
    %c0_i32 = arith.constant 0 : i32
    %c0_i32_0 = arith.constant 0 : i32
    return %arg0, %c0_i32, %arg1 : i32, i32, i32
  }
}

</mosaic_0001>

<bundles_post_ra>
// kernel: tpu_custom_call.1
= control target key start
LH: loop header
LB: loop body
LE: loop exit
PB: predicated region body
PF: predicated region fallthrough
CT: control target
= control target key end

     0   :  { %8 = vsyncpa [#allocation3], 0  ;;  %s6055_s0 = inlined_call_operand.vmem [shape: f32[2,18,18,4], index: 0, kind: input, shape index: {}]   ;;  %s6056_s1 = inlined_call_operand.vmem [shape: f32[9,4,8], index: 1, kind: input, shape index: {}]   ;;  %s6057_s2 = inlined_call_operand.vmem [shape: f32[1,8], index: 2, kind: input, shape index: {}]   ;;  %s6058_s3 = inlined_call_operand.hbm [shape: f32[2,8,256], index: 3, kind: output, shape index: {}]  }
   0x1   :  { %10 = vsyncpa [#allocation3 + $0x1], 0  ;;  %s4389_s12 = smov 0   ;;  %s4391_s13 = smov 0  }
   0x2   :  { %s4393_s14 = smov 0   ;;  %s4395_s15 = smov 0  }
   0x3   :  { %s4397_s16 = smov 0   ;;  %s4399_s17 = smov 0  }
   0x4 LB: > { %s3174_s18 = sadd.s32 4294967295, %s4366_s17   ;;  %s3175_s19 = sadd.s32 4294967294, %s4366_s17   ;;  %s4366_s17 = sphi %s4399_s17, %s16_s17   ;;  %s4362_s16 = sphi %s4397_s16, %s6275_s16   ;;  %s4358_s15 = sphi %s4395_s15, %s6274_s15   ;;  %s4354_s14 = sphi %s4393_s14, %s6273_s14   ;;  %s4350_s13 = sphi %s4391_s13, %s6272_s13   ;;  %s4346_s12 = sphi %s4389_s12, %s6271_s12  }
   0x5   : > { %s28_s20 = sadd.s32 1, %s4362_s16  ;;  %s105_s21 = sadd.s32 1, %s4354_s14 }
   0x6   : > { %p30_p0 = scmp.ge.s32.totalorder %s28_s20, 2  ;;  %p115_p1 = scmp.ne.s32.totalorder %s4354_s14, %s4350_s13 }
   0x7   : > { %p116_p2 = scmp.eq.s32.totalorder %s3174_s18, 1  ;;  %p121_p3 = scmp.ne.s32.totalorder %s4350_s13, %s4346_s12 }
   0x8   : > { %s6277_s20 = smov (%p30_p0, %s28_s20), 0  ;;  %p122_p5 = scmp.eq.s32.totalorder %s3175_s19, 1 }
   0x9   : > { %p4429_p4 = por %p116_p2, %p115_p1  ;;  %s100_s23 = ssub.s32 %s4362_s16, %s6277_s20 }
   0xa   : > { %p3178_p6 = scmp.ge.s32.totalorder %s4366_s17, 1  ;;  %p103_p7 = scmp.eq.s32.totalorder %s100_s23, 0 }
   0xb   : > { %p4436_p8 = por %p122_p5, %p121_p3  ;;  %p154_p9 = scmp.lt.s32.totalorder %s4366_s17, 3 }
   0xc   : > { %s4442_s25 = scalar_select %p103_p7, %s4354_s14, %s105_s21  }
   0xd   : > { %p155_p10 = pnand %p3178_p6, %p154_p9 }
   0xf   : > { %158 = sbr.rel (%p155_p10) target bundleno = 628 (0x274), region = 32 }
  0x14   : > { %v242_v0 = vld [vmem:[%s6056_s1 + $0x4] sm:$0xf]  ;;  %vm444_vm0 = vcmask 1043456   ;;  %p178_p11 = scmp.lt.s32.totalorder %s4358_s15, 1  ;;  %v241_v1 = vld [vmem:[%s6056_s1] sm:$0xf] }
  0x15   : > { %4232 = vmatprep.subr.msk.mxu1 %vm444_vm0, %v242_v0  ;;  %3782 = vmatprep.subr.msk.mxu0 %vm444_vm0, %v242_v0  ;;  %v243_v2 = vld [vmem:[%s6056_s1 + $0x8] sm:$0xf]  ;;  %vm298_vm1 = vcmask 1046528   ;;  %vm379_vm2 = vcmask 31744   ;;  %v4507_v21 = vld [vmem:[%s6056_s1 + $0xc] sm:$0xf] }
  0x16   : > { %4233 = vmatpush3.msk.msra.mxu1 %vm444_vm0, %v242_v0  ;;  %3783 = vmatpush3.msk.msra.mxu0 %vm444_vm0, %v242_v0  ;;  %s179_s5 = scalar_select %p178_p11, %s4358_s15, 1  ;;  %v4525_v28 = vld [vmem:[%s6056_s1 + $0x10] sm:$0xf]  ;;  %vm965_vm3 = vcmask 1045504  }
  0x17   : > { %3832 = vmatprep.subr.msk.mxu1 %vm444_vm0, %v241_v1  ;;  %3882 = vmatprep.subr.msk.mxu0 %vm444_vm0, %v243_v2  ;;  %s175_s7 = sand.u32 1, %s4350_s13   ;;  %s3484_s11 = sshll.u32 %s4358_s15, 8 }
  0x18   : > { %s4234_s6 = smul.u32 432, %s179_s5  ;;  %s3179_s8 = sshll.u32 %s175_s7, 4 }
  0x19   : > { %s3100_s21 = scalar_lea.hbm %s6058_s3, %s3484_s11  ;;  %s3086_s23 = scalar_lea.sflag [#allocation3], %s175_s7 }
  0x1a   : > { %s4464_s9 = scalar_lea.vmem %s6055_s0, %s4234_s6  ;;  %s4368_s27 = smov [#allocation2]  }
  0x1b   : > { %v4467_v3 = vld [vmem:[%s4464_s9] sm:$0xff]  ;;  %v4470_v4 = vld [vmem:[%s4464_s9 + $0x8] sm:$0xff]  ;;  %v4482_v10 = vld [vmem:[%s4464_s9 + $0x10] sm:$0x3]  ;;  %s4294_s28 = sshll.u32 %s4368_s27, 4  ;;  %s4295_s28 = int_to_ptr.vmem [resolvable:$false] %s4294_s28 }
  0x1c   : > { %v4473_v5 = vld [vmem:[%s4464_s9 + $0xc0] sm:$0xff]  ;;  %v299_v6 = vrot.slane %v4467_v3, 1  ;;  %v300_v7 = vrot.slane %v4470_v4, 1  ;;  %v4478_v8 = vld [vmem:[%s4464_s9 + $0xc8] sm:$0xff]  ;;  %v302_v12 = vrot.slane %v4482_v10, 1  ;;  %v4490_v14 = vld [vmem:[%s4464_s9 + $0x18] sm:$0xff] }
  0x1d   : > { %v339_v9 = vrot.slane %v4473_v5, 1  ;;  %v340_v11 = vrot.slane %v4478_v8, 1  ;;  %v4487_v13 = vld [vmem:[%s4464_s9 + $0xd0] sm:$0x3]  ;;  %v4495_v17 = vld [vmem:[%s4464_s9 + $0x20] sm:$0xff]  ;;  %v304_v18 = vrot.slane %v4490_v14, 1 }
  0x1e   : > { %v301_v15 = vsel %vm298_vm1, %v299_v6, %v300_v7  ;;  %v342_v16 = vrot.slane %v4487_v13, 1  ;;  %v4499_v19 = vld [vmem:[%s4464_s9 + $0xd8] sm:$0xff]  ;;  %v4502_v20 = vld [vmem:[%s4464_s9 + $0xe0] sm:$0xff]  ;;  %v303_v23 = vsel %vm298_vm1, %v300_v7, %v302_v12  ;;  %v305_v24 = vrot.slane %v4495_v17, 1  ;;  %v4517_v26 = vld [vmem:[%s4464_s9 + $0x28] sm:$0x3] }
  0x1f   : > { %3784 = vmatprep.mubr.msk.f32.mxu0 %vm379_vm2, %v301_v15  ;;  %v4511_v22 = vsel %vm298_vm1, %v339_v9, %v340_v11  ;;  %v344_v25 = vrot.slane %v4499_v19, 1  ;;  %v4520_v27 = vld [vmem:[%s4464_s9 + $0xe8] sm:$0x3]  ;;  %v345_v30 = vrot.slane %v4502_v20, 1  ;;  %v307_v31 = vrot.slane %v4517_v26, 1  ;;  %v4537_v33 = vld [vmem:[%s4464_s9 + $0x30] sm:$0xff] }
  0x20   : > { %6143 = vst [vmem:[#allocation5_spill] sm:$0xff] %v4511_v22  ;;  %3808 = vmatprep.mubr.msk.f32.mxu1 %vm379_vm2, %v4511_v22  ;;  %3785 = vmatmul.mubr.msk.f32.vlgmr.msra.gmra.mxu0 %vm379_vm2, %v303_v23  ;;  %v4531_v29 = vsel %vm298_vm1, %v340_v11, %v342_v16  ;;  %v347_v32 = vrot.slane %v4520_v27, 1  ;;  %v4540_v34 = vld [vmem:[%s4464_s9 + $0x38] sm:$0xff]  ;;  %v4543_v35 = vld [vmem:[%s4464_s9 + $0xf0] sm:$0xff]  ;;  %v4549_v36 = vsel %vm298_vm1, %v304_v18, %v305_v24  ;;  %v309_v37 = vrot.slane %v4537_v33, 1  ;;  %v4577_v47 = vld [vmem:[%s4464_s9 + $0x48] sm:$0xff] }
  0x21   : > { %6144 = vst [vmem:[#allocation6_spill] sm:$0xff] %v4531_v29  ;;  %3809 = vmatmul.mubr.msk.f32.vlgmr.msra.gmra.mxu1 %vm379_vm2, %v4531_v29  ;;  %3883 = vmatpush3.msk.msra.mxu0 %vm444_vm0, %v243_v2  ;;  %6145 = vst [vmem:[#allocation7_spill] sm:$0xff] %v4549_v36  ;;  %v310_v38 = vrot.slane %v4540_v34, 1  ;;  %v4554_v39 = vld [vmem:[%s4464_s9 + $0xf8] sm:$0xff]  ;;  %v349_v40 = vrot.slane %v4543_v35, 1  ;;  %v4564_v42 = vsel %vm298_vm1, %v344_v25, %v345_v30  ;;  %v4580_v48 = vld [vmem:[%s4464_s9 + $0x50] sm:$0xff] }
  0x22   : > { %v4558_v41 = vld [vmem:[%s4464_s9 + $0x40] sm:$0x3]  ;;  %3833 = vmatpush3.msk.msra.mxu1 %vm444_vm0, %v241_v1  ;;  %3787 = vmatprep.mubr.msk.f32.mxu0 %vm379_vm2, %v4549_v36  ;;  %6146 = vst [vmem:[#allocation8_spill] sm:$0xff] %v4564_v42  ;;  %v4567_v43 = vsel %vm298_vm1, %v305_v24, %v307_v31  ;;  %v4570_v44 = vsel %vm298_vm1, %v345_v30, %v347_v32  ;;  %v350_v45 = vrot.slane %v4554_v39, 1  ;;  %v314_v52 = vrot.slane %v4577_v47, 1  ;;  %v4591_v53 = vld [vmem:[%s4464_s9 + $0x108] sm:$0xff] }
  0x23   : > { %6147 = vst [vmem:[#allocation9_spill] sm:$0xff] %v4567_v43  ;;  %6148 = vst [vmem:[#allocation10_spill] sm:$0xff] %v4570_v44  ;;  %v4574_v46 = vld [vmem:[%s4464_s9 + $0x100] sm:$0x3]  ;;  %3811 = vmatprep.mubr.msk.f32.mxu1 %vm379_vm2, %v4564_v42  ;;  %v4585_v49 = vsel %vm298_vm1, %v309_v37, %v310_v38  ;;  %v312_v50 = vrot.slane %v4558_v41, 1  ;;  %v4594_v54 = vld [vmem:[%s4464_s9 + $0x110] sm:$0xff]  ;;  %3932 = vmatprep.subr.msk.mxu1 %vm444_vm0, %v4507_v21 }
  0x24   : > { %6149 = vst [vmem:[#allocation11_spill] sm:$0xff] %v4585_v49  ;;  %v352_v51 = vrot.slane %v4574_v46, 1  ;;  %v4597_v55 = vld [vmem:[%s4464_s9 + $0x60] sm:$0xff]  ;;  %3788 = vmatmul.mubr.msk.f32.gmra.mxu0 %vm379_vm2, %v4567_v43  ;;  %v4604_v56 = vsel %vm298_vm1, %v349_v40, %v350_v45  ;;  %v315_v57 = vrot.slane %v4580_v48, 1  ;;  %v354_v58 = vrot.slane %v4591_v53, 1  ;;  %v4613_v61 = vld [vmem:[%s4464_s9 + $0x68] sm:$0xff]  ;;  %3982 = vmatprep.subr.msk.mxu0 %vm444_vm0, %v4525_v28 }
  0x25   : > { %6150 = vst [vmem:[#allocation12_spill] sm:$0xff] %v4604_v56  ;;  %v355_v59 = vrot.slane %v4594_v54, 1  ;;  %v4610_v60 = vld [vmem:[%s4464_s9 + $0x58] sm:$0x3]  ;;  %3812 = vmatmul.mubr.msk.f32.gmra.mxu1 %vm379_vm2, %v4570_v44  ;;  %3790 = vmatprep.mubr.msk.f32.mxu0 %vm379_vm2, %v4585_v49  ;;  %v4622_v62 = vsel %vm298_vm1, %v310_v38, %v312_v50  ;;  %v319_v1 = vrot.slane %v4597_v55, 1  ;;  %v4630_v2 = vld [vmem:[%s4464_s9 + $0x120] sm:$0xff] }
  0x26   : > { %6151 = vst [vmem:[#allocation13_spill] sm:$0xff] %v4622_v62  ;;  %v317_v63 = vrot.slane %v4610_v60, 1  ;;  %v4626_v0 = vld [vmem:[%s4464_s9 + $0x118] sm:$0x3]  ;;  %v4633_v6 = vld [vmem:[%s4464_s9 + $0x128] sm:$0xff]  ;;  %3814 = vmatprep.mubr.msk.f32.mxu1 %vm379_vm2, %v4604_v56  ;;  %v4638_v7 = vsel %vm298_vm1, %v350_v45, %v352_v51  ;;  %v4641_v9 = vsel %vm298_vm1, %v314_v52, %v315_v57  ;;  %v320_v12 = vrot.slane %v4613_v61, 1 }
  0x27   : > { %6152 = vst [vmem:[#allocation14_spill] sm:$0xff] %v4638_v7  ;;  %6153 = vst [vmem:[#allocation15_spill] sm:$0xff] %v4641_v9  ;;  %v357_v11 = vrot.slane %v4626_v0, 1  ;;  %v4646_v15 = vld [vmem:[%s4464_s9 + $0x70] sm:$0x3]  ;;  %v4652_v18 = vsel %vm298_vm1, %v354_v58, %v355_v59  ;;  %v359_v23 = vrot.slane %v4630_v2, 1 }
  0x28   : > { %v4649_v16 = vld [vmem:[%s4464_s9 + $0x130] sm:$0x3]  ;;  %6154 = vst [vmem:[#allocation16_spill] sm:$0xff] %v4652_v18  ;;  %v360_v24 = vrot.slane %v4633_v6, 1  ;;  %v4657_v25 = vld [vmem:[%s4464_s9 + $0x78] sm:$0xff]  ;;  %v4660_v30 = vld [vmem:[%s4464_s9 + $0x80] sm:$0xff]  ;;  %3791 = vmatmul.mubr.msk.f32.gmra.mxu0 %vm379_vm2, %v4622_v62  ;;  %v4675_v37 = vsel %vm298_vm1, %v315_v57, %v317_v63  ;;  %v4685_v50 = vsel %vm298_vm1, %v319_v1, %v320_v12 }
  0x29   : > { %v4665_v31 = vld [vmem:[%s4464_s9 + $0x138] sm:$0xff]  ;;  %v4668_v32 = vld [vmem:[%s4464_s9 + $0x140] sm:$0xff]  ;;  %3815 = vmatmul.mubr.msk.f32.gmra.mxu1 %vm379_vm2, %v4638_v7  ;;  %3793 = vmatprep.mubr.msk.f32.mxu0 %vm379_vm2, %v4641_v9  ;;  %6155 = vst [vmem:[#allocation17_spill] sm:$0xff] %v4675_v37  ;;  %v322_v38 = vrot.slane %v4646_v15, 1  ;;  %v362_v40 = vrot.slane %v4649_v16, 1  ;;  %v4682_v45 = vsel %vm298_vm1, %v355_v59, %v357_v11  ;;  %6157 = vst [vmem:[#allocation19_spill] sm:$0xff] %v4685_v50 }
  0x2a   : > { %3817 = vmatprep.mubr.msk.f32.mxu1 %vm379_vm2, %v4652_v18  ;;  %6156 = vst [vmem:[#allocation18_spill] sm:$0xff] %v4682_v45  ;;  %v324_v51 = vrot.slane %v4657_v25, 1  ;;  %v325_v52 = vrot.slane %v4660_v30, 1  ;;  %v4690_v57 = vld [vmem:[%s4464_s9 + $0x88] sm:$0x3]  ;;  %v4696_v63 = vsel %vm298_vm1, %v359_v23, %v360_v24  ;;  %v364_v7 = vrot.slane %v4665_v31, 1 }
  0x2b   : > { %v4693_v58 = vld [vmem:[%s4464_s9 + $0x148] sm:$0x3]  ;;  %6158 = vst [vmem:[#allocation20_spill] sm:$0xff] %v4696_v63  ;;  %v365_v18 = vrot.slane %v4668_v32, 1  ;;  %v4701_v59 = vld [vmem:[%s4464_s9 + $0x90] sm:$0xff]  ;;  %v4704_v1 = vld [vmem:[%s4464_s9 + $0x98] sm:$0xff]  ;;  %v4719_v23 = vsel %vm298_vm1, %v320_v12, %v322_v38  ;;  %v4726_v29 = vsel %vm298_vm1, %v360_v24, %v362_v40 }
  0x2c   : > { %3794 = vmatmul.mubr.msk.f32.gmra.mxu0 %vm379_vm2, %v4675_v37  ;;  %v4709_v11 = vld [vmem:[%s4464_s9 + $0x150] sm:$0xff]  ;;  %v4712_v56 = vld [vmem:[%s4464_s9 + $0x158] sm:$0xff]  ;;  %6160 = vst [vmem:[#allocation22_spill] sm:$0xff] %v4719_v23  ;;  %v327_v44 = vrot.slane %v4690_v57, 1  ;;  %v367_v42 = vrot.slane %v4693_v58, 1  ;;  %6161 = vst [vmem:[#allocation23_spill] sm:$0xff] %v4726_v29 }
  0x2d   : > { %6159 = vst [vmem:[#allocation21_spill] sm:$0xff] %v4712_v56  ;;  %3818 = vmatmul.mubr.msk.f32.gmra.mxu1 %vm379_vm2, %v4682_v45  ;;  %3796 = vmatprep.mubr.msk.f32.mxu0 %vm379_vm2, %v4685_v50  ;;  %v4729_v45 = vsel %vm298_vm1, %v324_v51, %v325_v52  ;;  %v329_v22 = vrot.slane %v4701_v59, 1  ;;  %v330_v12 = vrot.slane %v4704_v1, 1  ;;  %v4734_v38 = vld [vmem:[%s4464_s9 + $0xa0] sm:$0x3]  ;;  %v4737_v50 = vsel %vm298_vm1, %v364_v7, %v365_v18  ;;  %v4745_v24 = vld [vmem:[%s4464_s9 + $0xa8] sm:$0xff] }
  0x2e   : > { %3820 = vmatprep.mubr.msk.f32.mxu1 %vm379_vm2, %v4696_v63  ;;  %6162 = vst [vmem:[#allocation24_spill] sm:$0xff] %v4729_v45  ;;  %6163 = vst [vmem:[#allocation25_spill] sm:$0xff] %v4737_v50  ;;  %v369_v37 = vrot.slane %v4709_v11, 1  ;;  %v370_v9 = vrot.slane %v4712_v56, 1  ;;  %v4742_v63 = vld [vmem:[%s4464_s9 + $0x160] sm:$0x3]  ;;  %v4763_v7 = vsel %vm298_vm1, %v325_v52, %v327_v44  ;;  %v4766_v49 = vsel %vm298_vm1, %v365_v18, %v367_v42 }
  0x2f   : > { %v4748_v40 = vld [vmem:[%s4464_s9 + $0xb0] sm:$0xff]  ;;  %v4753_v51 = vld [vmem:[%s4464_s9 + $0x168] sm:$0xff]  ;;  %6165 = vst [vmem:[#allocation27_spill] sm:$0xff] %v4763_v7  ;;  %6166 = vst [vmem:[#allocation28_spill] sm:$0xff] %v4766_v49  ;;  %v332_v43 = vrot.slane %v4734_v38, 1  ;;  %v372_v36 = vrot.slane %v4742_v63, 1 }
  0x30   : > { %3797 = vmatmul.mubr.msk.f32.gmra.mxu0 %vm379_vm2, %v4719_v23  ;;  %v4756_v62 = vld [vmem:[%s4464_s9 + $0x170] sm:$0xff]  ;;  %v4772_v23 = vsel %vm298_vm1, %v329_v22, %v330_v12  ;;  %v4778_v56 = vld [vmem:[%s4464_s9 + $0xb8] sm:$0x3]  ;;  %v4781_v44 = vsel %vm298_vm1, %v369_v37, %v370_v9  ;;  %v374_v42 = vrot.slane %v4753_v51, 1  ;;  %s4296_s15 = scalar_lea.vmem %s4295_s28, 512 }
  0x31   : > { %6164 = vst [vmem:[#allocation26_spill] sm:$0xff] %v4756_v62  ;;  %3821 = vmatmul.mubr.msk.f32.gmra.mxu1 %vm379_vm2, %v4726_v29  ;;  %3799 = vmatprep.mubr.msk.f32.mxu0 %vm379_vm2, %v4729_v45  ;;  %6167 = vst [vmem:[#allocation29_spill] sm:$0xff] %v4772_v23  ;;  %v334_v29 = vrot.slane %v4745_v24, 1  ;;  %v335_v45 = vrot.slane %v4748_v40, 1  ;;  %v375_v18 = vrot.slane %v4756_v62, 1  ;;  %v4795_v22 = vsel %vm298_vm1, %v330_v12, %v332_v43 }
  0x32   : > { %3823 = vmatprep.mubr.msk.f32.mxu1 %vm379_vm2, %v4737_v50  ;;  %6168 = vst [vmem:[#allocation30_spill] sm:$0xff] %v4781_v44  ;;  %v4786_v52 = vld [vmem:[%s4464_s9 + $0x178] sm:$0x3]  ;;  %6169 = vst [vmem:[#allocation31_spill] sm:$0xff] %v4795_v22  ;;  %v337_v37 = vrot.slane %v4778_v56, 1  ;;  %v966_v50 = vrot.slane %v4467_v3, 2  ;;  %v4802_v62 = vsel %vm298_vm1, %v370_v9, %v372_v36 }
  0x33   : > { %6170 = vst [vmem:[#allocation32_spill] sm:$0xff] %v4802_v62  ;;  %v4810_v43 = vsel %vm298_vm1, %v374_v42, %v375_v18  ;;  %v969_v12 = vrot.slane %v4482_v10, 2  ;;  %v971_v10 = vrot.slane %v4490_v14, 2  ;;  %v972_v42 = vrot.slane %v4495_v17, 2 }
  0x34   : > { %3800 = vmatmul.mubr.msk.f32.gmra.mxu0 %vm379_vm2, %v4763_v7  ;;  %v4805_v7 = vsel %vm298_vm1, %v334_v29, %v335_v45  ;;  %6172 = vst [vmem:[#allocation34_spill] sm:$0xff] %v4810_v43  ;;  %v4820_v29 = vsel %vm298_vm1, %v335_v45, %v337_v37  ;;  %v974_v37 = vrot.slane %v4517_v26, 2  ;;  %v979_v26 = vrot.slane %v4558_v41, 2 }
  0x35   : > { %3824 = vmatmul.mubr.msk.f32.gmra.mxu1 %vm379_vm2, %v4766_v49  ;;  %3802 = vmatprep.mubr.msk.f32.mxu0 %vm379_vm2, %v4772_v23  ;;  %6171 = vst [vmem:[#allocation33_spill] sm:$0xff] %v4805_v7  ;;  %v377_v49 = vrot.slane %v4786_v52, 1  ;;  %v967_v23 = vrot.slane %v4470_v4, 2  ;;  %6173 = vst [vmem:[#allocation35_spill] sm:$0xff] %v4820_v29  ;;  %v984_v41 = vrot.slane %v4610_v60, 2 }
  0x36   : > { %3826 = vmatprep.mubr.msk.f32.mxu1 %vm379_vm2, %v4781_v44 }
  0x37   : > { %v4825_v36 = vsel %vm298_vm1, %v375_v18, %v377_v49  ;;  %v968_v9 = vsel %vm965_vm3, %v966_v50, %v967_v23  ;;  %v970_v45 = vsel %vm965_vm3, %v967_v23, %v969_v12  ;;  %v976_v49 = vrot.slane %v4537_v33, 2  ;;  %v4861_v23 = vld [vmem:[%s6056_s1 + $0x18] sm:$0xf] }
  0x38   : > { %3803 = vmatmul.mubr.msk.f32.gmra.mxu0 %vm379_vm2, %v4795_v22  ;;  %6174 = vst [vmem:[#allocation36_spill] sm:$0xff] %v4825_v36  ;;  %v977_v50 = vrot.slane %v4540_v34, 2  ;;  %v4843_v18 = vsel %vm965_vm3, %v971_v10, %v972_v42  ;;  %v982_v12 = vrot.slane %v4580_v48, 2 }
  0x39   : > { %3827 = vmatmul.mubr.msk.f32.gmra.mxu1 %vm379_vm2, %v4802_v62  ;;  %3805 = vmatprep.mubr.msk.f32.mxu0 %vm379_vm2, %v4805_v7 }
  0x3a   : > { %3829 = vmatprep.mubr.msk.f32.mxu1 %vm379_vm2, %v4810_v43  ;;  %v4902_v60 = vsel %vm965_vm3, %v982_v12, %v984_v41  ;;  %v996_v41 = vrot.slane %v4701_v59, 2 }
  0x3c   : > { %3806 = vmatmul.mubr.msk.f32.gmra.mxu0 %vm379_vm2, %v4820_v29 }
  0x3d   : > { %3830 = vmatmul.mubr.msk.f32.gmra.mxu1 %vm379_vm2, %v4825_v36  ;;  %3884 = vmatprep.mubr.msk.f32.mxu0 %vm379_vm2, %v968_v9  ;;  %v4848_v9 = vld [vmem:[%s6056_s1 + $0x14] sm:$0xf] }
  0x3e   : > { %3834 = vmatprep.mubr.msk.f32.mxu1 %vm379_vm2, %v4467_v3  ;;  %v4855_v3 = vsel %vm965_vm3, %v972_v42, %v974_v37  ;;  %v986_v42 = vrot.slane %v4597_v55, 2  ;;  %v989_v37 = vrot.slane %v4646_v15, 2 }
  0x40   : > { %3885 = vmatmul.mubr.msk.f32.vlgmr.msra.gmra.mxu0 %vm379_vm2, %v970_v45  ;;  %v987_v45 = vrot.slane %v4613_v61, 2 }
  0x41   : > { %3835 = vmatmul.mubr.msk.f32.vlgmr.msra.gmra.mxu1 %vm379_vm2, %v4470_v4  ;;  %3983 = vmatpush3.msk.msra.mxu0 %vm444_vm0, %v4525_v28  ;;  %v4868_v4 = vsel %vm965_vm3, %v976_v49, %v977_v50  ;;  %v981_v28 = vrot.slane %v4577_v47, 2 }
  0x42   : > { %3933 = vmatpush3.msk.msra.mxu1 %vm444_vm0, %v4507_v21  ;;  %3837 = vmatprep.mubr.msk.f32.mxu1 %vm379_vm2, %v4490_v14  ;;  %v4885_v21 = vsel %vm965_vm3, %v977_v50, %v979_v26  ;;  %v4908_v49 = vsel %vm965_vm3, %v986_v42, %v987_v45  ;;  %v991_v50 = vrot.slane %v4657_v25, 2  ;;  %v992_v26 = vrot.slane %v4660_v30, 2 }
  0x43   : > { %3887 = vmatprep.mubr.msk.f32.mxu0 %vm379_vm2, %v4843_v18  ;;  %4032 = vmatprep.subr.msk.mxu1 %vm444_vm0, %v4848_v9  ;;  %v4891_v10 = vsel %vm965_vm3, %v981_v28, %v982_v12  ;;  %v4919_v15 = vsel %vm965_vm3, %v987_v45, %v989_v37  ;;  %v994_v28 = vrot.slane %v4690_v57, 2  ;;  %v997_v42 = vrot.slane %v4704_v1, 2 }
  0x44   : > { %3888 = vmatmul.mubr.msk.f32.gmra.mxu0 %vm379_vm2, %v4855_v3  ;;  %4082 = vmatprep.subr.msk.mxu0 %vm444_vm0, %v4861_v23  ;;  %6175 = vst [vmem:[#allocation37_spill] sm:$0xff] %v4919_v15  ;;  %v4925_v12 = vsel %vm965_vm3, %v991_v50, %v992_v26  ;;  %v999_v45 = vrot.slane %v4734_v38, 2  ;;  %v1001_v50 = vrot.slane %v4745_v24, 2 }
  0x45   : > { %3838 = vmatmul.mubr.msk.f32.gmra.mxu1 %vm379_vm2, %v4495_v17  ;;  %3890 = vmatprep.mubr.msk.f32.mxu0 %vm379_vm2, %v4868_v4  ;;  %v4936_v57 = vsel %vm965_vm3, %v992_v26, %v994_v28  ;;  %v4942_v37 = vsel %vm965_vm3, %v996_v41, %v997_v42  ;;  %v1004_v26 = vrot.slane %v4778_v56, 2  ;;  %v1006_v41 = vrot.slane %v4473_v5, 2 }
  0x46   : > { %3840 = vmatprep.mubr.msk.f32.mxu1 %vm379_vm2, %v4537_v33  ;;  %6176 = vst [vmem:[#allocation38_spill] sm:$0xff] %v4936_v57  ;;  %v4953_v38 = vsel %vm965_vm3, %v997_v42, %v999_v45  ;;  %v1009_v42 = vrot.slane %v4487_v13, 2 }
  0x47   : > { %6177 = vst [vmem:[#allocation39_spill] sm:$0xff] %v4953_v38 }
  0x48   : > { %3891 = vmatmul.mubr.msk.f32.gmra.mxu0 %vm379_vm2, %v4885_v21 }
  0x49   : > { %3841 = vmatmul.mubr.msk.f32.gmra.mxu1 %vm379_vm2, %v4540_v34  ;;  %3893 = vmatprep.mubr.msk.f32.mxu0 %vm379_vm2, %v4891_v10 }
  0x4a   : > { %3843 = vmatprep.mubr.msk.f32.mxu1 %vm379_vm2, %v4577_v47 }
  0x4c   : > { %3894 = vmatmul.mubr.msk.f32.gmra.mxu0 %vm379_vm2, %v4902_v60 }
  0x4d   : > { %3844 = vmatmul.mubr.msk.f32.gmra.mxu1 %vm379_vm2, %v4580_v48  ;;  %3896 = vmatprep.mubr.msk.f32.mxu0 %vm379_vm2, %v4908_v49 }
  0x4e   : > { %3846 = vmatprep.mubr.msk.f32.mxu1 %vm379_vm2, %v4597_v55 }
  0x50   : > { %3897 = vmatmul.mubr.msk.f32.gmra.mxu0 %vm379_vm2, %v4919_v15  ;;  %v1002_v15 = vrot.slane %v4748_v40, 2 }
  0x51   : > { %3847 = vmatmul.mubr.msk.f32.gmra.mxu1 %vm379_vm2, %v4613_v61  ;;  %3899 = vmatprep.mubr.msk.f32.mxu0 %vm379_vm2, %v4925_v12 }
  0x52   : > { %3849 = vmatprep.mubr.msk.f32.mxu1 %vm379_vm2, %v4657_v25  ;;  %v4959_v28 = vsel %vm965_vm3, %v1001_v50, %v1002_v15  ;;  %v4970_v56 = vsel %vm965_vm3, %v1002_v15, %v1004_v26  ;;  %v1011_v50 = vrot.slane %v4499_v19, 2  ;;  %v1014_v15 = vrot.slane %v4520_v27, 2 }
  0x53   : > { %6178 = vst [vmem:[#allocation40_spill] sm:$0xff] %v4970_v56 }
  0x54   : > { %3900 = vmatmul.mubr.msk.f32.gmra.mxu0 %vm379_vm2, %v4936_v57  ;;  %v1007_v57 = vrot.slane %v4478_v8, 2 }
  0x55   : > { %3850 = vmatmul.mubr.msk.f32.gmra.mxu1 %vm379_vm2, %v4660_v30  ;;  %3902 = vmatprep.mubr.msk.f32.mxu0 %vm379_vm2, %v4942_v37 }
  0x56   : > { %3852 = vmatprep.mubr.msk.f32.mxu1 %vm379_vm2, %v4701_v59  ;;  %v4976_v45 = vsel %vm965_vm3, %v1006_v41, %v1007_v57  ;;  %v4987_v13 = vsel %vm965_vm3, %v1007_v57, %v1009_v42  ;;  %v1016_v41 = vrot.slane %v4543_v35, 2  ;;  %v1019_v57 = vrot.slane %v4574_v46, 2 }
  0x57   : > { %6179 = vst [vmem:[#allocation41_spill] sm:$0xff] %v4987_v13 }
  0x58   : > { %3903 = vmatmul.mubr.msk.f32.gmra.mxu0 %vm379_vm2, %v4953_v38  ;;  %v1012_v38 = vrot.slane %v4502_v20, 2 }
  0x59   : > { %3853 = vmatmul.mubr.msk.f32.gmra.mxu1 %vm379_vm2, %v4704_v1  ;;  %3905 = vmatprep.mubr.msk.f32.mxu0 %vm379_vm2, %v4959_v28 }
  0x5a   : > { %3855 = vmatprep.mubr.msk.f32.mxu1 %vm379_vm2, %v4745_v24  ;;  %v4993_v26 = vsel %vm965_vm3, %v1011_v50, %v1012_v38  ;;  %v5004_v27 = vsel %vm965_vm3, %v1012_v38, %v1014_v15  ;;  %v1021_v50 = vrot.slane %v4591_v53, 2  ;;  %v1024_v38 = vrot.slane %v4626_v0, 2 }
  0x5b   : > { %6180 = vst [vmem:[#allocation42_spill] sm:$0xff] %v5004_v27 }
  0x5c   : > { %3906 = vmatmul.mubr.msk.f32.gmra.mxu0 %vm379_vm2, %v4970_v56  ;;  %v1017_v56 = vrot.slane %v4554_v39, 2 }
  0x5d   : > { %3856 = vmatmul.mubr.msk.f32.gmra.mxu1 %vm379_vm2, %v4748_v40  ;;  %3908 = vmatprep.mubr.msk.f32.mxu0 %vm379_vm2, %v4976_v45 }
  0x5e   : > { %3858 = vmatprep.mubr.msk.f32.mxu1 %vm379_vm2, %v4473_v5  ;;  %v5010_v42 = vsel %vm965_vm3, %v1016_v41, %v1017_v56  ;;  %v5021_v46 = vsel %vm965_vm3, %v1017_v56, %v1019_v57  ;;  %v1026_v41 = vrot.slane %v4630_v2, 2  ;;  %v1029_v56 = vrot.slane %v4649_v16, 2 }
  0x5f   : > { %6181 = vst [vmem:[#allocation43_spill] sm:$0xff] %v5021_v46 }
  0x60   : > { %3909 = vmatmul.mubr.msk.f32.gmra.mxu0 %vm379_vm2, %v4987_v13  ;;  %v1022_v13 = vrot.slane %v4594_v54, 2 }
  0x61   : > { %3859 = vmatmul.mubr.msk.f32.gmra.mxu1 %vm379_vm2, %v4478_v8  ;;  %3911 = vmatprep.mubr.msk.f32.mxu0 %vm379_vm2, %v4993_v26 }
  0x62   : > { %3861 = vmatprep.mubr.msk.f32.mxu1 %vm379_vm2, %v4499_v19  ;;  %v5027_v15 = vsel %vm965_vm3, %v1021_v50, %v1022_v13  ;;  %v5038_v0 = vsel %vm965_vm3, %v1022_v13, %v1024_v38  ;;  %v1031_v50 = vrot.slane %v4665_v31, 2  ;;  %v1034_v13 = vrot.slane %v4693_v58, 2 }
  0x63   : > { %6182 = vst [vmem:[#allocation44_spill] sm:$0xff] %v5027_v15  ;;  %6183 = vst [vmem:[#allocation45_spill] sm:$0xff] %v5038_v0 }
  0x64   : > { %3912 = vmatmul.mubr.msk.f32.gmra.mxu0 %vm379_vm2, %v5004_v27  ;;  %v1027_v27 = vrot.slane %v4633_v6, 2 }
  0x65   : > { %3862 = vmatmul.mubr.msk.f32.gmra.mxu1 %vm379_vm2, %v4502_v20  ;;  %3914 = vmatprep.mubr.msk.f32.mxu0 %vm379_vm2, %v5010_v42 }
  0x66   : > { %3864 = vmatprep.mubr.msk.f32.mxu1 %vm379_vm2, %v4543_v35  ;;  %v5044_v57 = vsel %vm965_vm3, %v1026_v41, %v1027_v27  ;;  %v5055_v16 = vsel %vm965_vm3, %v1027_v27, %v1029_v56  ;;  %v1036_v41 = vrot.slane %v4709_v11, 2  ;;  %v1039_v27 = vrot.slane %v4742_v63, 2 }
  0x67   : > { %6184 = vst [vmem:[#allocation46_spill] sm:$0xff] %v5044_v57  ;;  %6185 = vst [vmem:[#allocation47_spill] sm:$0xff] %v5055_v16 }
  0x68   : > { %3915 = vmatmul.mubr.msk.f32.gmra.mxu0 %vm379_vm2, %v5021_v46  ;;  %v1032_v46 = vrot.slane %v4668_v32, 2 }
  0x69   : > { %3865 = vmatmul.mubr.msk.f32.gmra.mxu1 %vm379_vm2, %v4554_v39  ;;  %3917 = vmatprep.mubr.msk.f32.mxu0 %vm379_vm2, %v5027_v15 }
  0x6a   : > { %3867 = vmatprep.mubr.msk.f32.mxu1 %vm379_vm2, %v4591_v53  ;;  %v5061_v38 = vsel %vm965_vm3, %v1031_v50, %v1032_v46  ;;  %v5072_v58 = vsel %vm965_vm3, %v1032_v46, %v1034_v13  ;;  %v1041_v50 = vrot.slane %v4753_v51, 2  ;;  %v1044_v46 = vrot.slane %v4786_v52, 2  ;;  %v6189_v52 = vld [vmem:[#allocation7_spill] sm:$0xff] }
  0x6c   : > { %3918 = vmatmul.mubr.msk.f32.gmra.mxu0 %vm379_vm2, %v5038_v0  ;;  %v6186_v0 = vld [vmem:[#allocation21_spill] sm:$0xff] }
  0x6d   : > { %3868 = vmatmul.mubr.msk.f32.gmra.mxu1 %vm379_vm2, %v4594_v54  ;;  %3920 = vmatprep.mubr.msk.f32.mxu0 %vm379_vm2, %v5044_v57  ;;  %v1037_v15 = vrot.slane %v6186_v0, 2 }
  0x6e   : > { %3870 = vmatprep.mubr.msk.f32.mxu1 %vm379_vm2, %v4630_v2 }
  0x6f   : > { %v5078_v56 = vsel %vm965_vm3, %v1036_v41, %v1037_v15  ;;  %v5089_v63 = vsel %vm965_vm3, %v1037_v15, %v1039_v27  ;;  %v6190_v41 = vld [vmem:[#allocation9_spill] sm:$0xff] }
  0x70   : > { %3921 = vmatmul.mubr.msk.f32.gmra.mxu0 %vm379_vm2, %v5055_v16  ;;  %v6187_v16 = vld [vmem:[#allocation26_spill] sm:$0xff]  ;;  %v5130_v27 = vld [vmem:[%s6056_s1 + $0x20] sm:$0xf] }
  0x71   : > { %3871 = vmatmul.mubr.msk.f32.gmra.mxu1 %vm379_vm2, %v4633_v6  ;;  %3923 = vmatprep.mubr.msk.f32.mxu0 %vm379_vm2, %v5061_v38  ;;  %v1042_v57 = vrot.slane %v6187_v16, 2 }
  0x72   : > { %3873 = vmatprep.mubr.msk.f32.mxu1 %vm379_vm2, %v4665_v31 }
  0x73   : > { %v5095_v13 = vsel %vm965_vm3, %v1041_v50, %v1042_v57  ;;  %v5104_v15 = vsel %vm965_vm3, %v1042_v57, %v1044_v46  ;;  %v5121_v57 = vld [vmem:[%s6056_s1 + $0x1c] sm:$0xf]  ;;  %v6195_v50 = vld [vmem:[#allocation19_spill] sm:$0xff]  ;;  %v6196_v46 = vld [vmem:[#allocation22_spill] sm:$0xff] }
  0x74   : > { %3924 = vmatmul.mubr.msk.f32.gmra.mxu0 %vm379_vm2, %v5072_v58  ;;  %6188 = vst [vmem:[#allocation21_spill] sm:$0xff] %v5104_v15 }
  0x75   : > { %3874 = vmatmul.mubr.msk.f32.gmra.mxu1 %vm379_vm2, %v4668_v32  ;;  %3926 = vmatprep.mubr.msk.f32.mxu0 %vm379_vm2, %v5078_v56 }
  0x76   : > { %3876 = vmatprep.mubr.msk.f32.mxu1 %vm379_vm2, %v4709_v11 }
  0x78   : > { %3927 = vmatmul.mubr.msk.f32.gmra.mxu0 %vm379_vm2, %v5089_v63 }
  0x79   : > { %3877 = vmatmul.mubr.msk.f32.gmra.mxu1 %vm379_vm2, %v6186_v0  ;;  %3929 = vmatprep.mubr.msk.f32.mxu0 %vm379_vm2, %v5095_v13 }
  0x7a   : > { %3879 = vmatprep.mubr.msk.f32.mxu1 %vm379_vm2, %v4753_v51 }
  0x7c   : > { %3930 = vmatmul.mubr.msk.f32.gmra.mxu0 %vm379_vm2, %v5104_v15 }
  0x7d   : > { %3880 = vmatmul.mubr.msk.f32.gmra.mxu1 %vm379_vm2, %v6187_v16  ;;  %3984 = vmatprep.mubr.msk.f32.mxu0 %vm379_vm2, %v6189_v52  ;;  %v6197_v52 = vld [vmem:[#allocation24_spill] sm:$0xff] }
  0x7e   : > { %3934 = vmatprep.mubr.msk.f32.mxu1 %vm379_vm2, %v4490_v14  ;;  %v6191_v14 = vld [vmem:[#allocation11_spill] sm:$0xff] }
  0x80   : > { %3985 = vmatmul.mubr.msk.f32.vlgmr.msra.gmra.mxu0 %vm379_vm2, %v6190_v41  ;;  %v6198_v41 = vld [vmem:[#allocation27_spill] sm:$0xff] }
  0x81   : > { %3935 = vmatmul.mubr.msk.f32.vlgmr.msra.gmra.mxu1 %vm379_vm2, %v4495_v17  ;;  %4083 = vmatpush3.msk.msra.mxu0 %vm444_vm0, %v4861_v23  ;;  %v6192_v17 = vld [vmem:[#allocation13_spill] sm:$0xff]  ;;  %v6193_v23 = vld [vmem:[#allocation15_spill] sm:$0xff] }
  0x82   : > { %4033 = vmatpush3.msk.msra.mxu1 %vm444_vm0, %v4848_v9  ;;  %3937 = vmatprep.mubr.msk.f32.mxu1 %vm379_vm2, %v4537_v33  ;;  %v6194_v9 = vld [vmem:[#allocation17_spill] sm:$0xff] }
  0x83   : > { %3987 = vmatprep.mubr.msk.f32.mxu0 %vm379_vm2, %v6191_v14  ;;  %4132 = vmatprep.subr.msk.mxu1 %vm444_vm0, %v5121_v57 }
  0x84   : > { %3988 = vmatmul.mubr.msk.f32.gmra.mxu0 %vm379_vm2, %v6192_v17  ;;  %4182 = vmatprep.subr.msk.mxu0 %vm444_vm0, %v5130_v27 }
  0x85   : > { %3938 = vmatmul.mubr.msk.f32.gmra.mxu1 %vm379_vm2, %v4540_v34  ;;  %3990 = vmatprep.mubr.msk.f32.mxu0 %vm379_vm2, %v6193_v23 }
  0x86   : > { %3940 = vmatprep.mubr.msk.f32.mxu1 %vm379_vm2, %v4577_v47 }
  0x88   : > { %3991 = vmatmul.mubr.msk.f32.gmra.mxu0 %vm379_vm2, %v6194_v9 }
  0x89   : > { %3941 = vmatmul.mubr.msk.f32.gmra.mxu1 %vm379_vm2, %v4580_v48  ;;  %3993 = vmatprep.mubr.msk.f32.mxu0 %vm379_vm2, %v6195_v50  ;;  %v6199_v50 = vld [vmem:[#allocation29_spill] sm:$0xff] }
  0x8a   : > { %3943 = vmatprep.mubr.msk.f32.mxu1 %vm379_vm2, %v4597_v55 }
  0x8c   : > { %3994 = vmatmul.mubr.msk.f32.gmra.mxu0 %vm379_vm2, %v6196_v46 }
  0x8d   : > { %3944 = vmatmul.mubr.msk.f32.gmra.mxu1 %vm379_vm2, %v4613_v61  ;;  %3996 = vmatprep.mubr.msk.f32.mxu0 %vm379_vm2, %v6197_v52  ;;  %v5247_v52 = vld [vmem:[%s4464_s9 + $0x190] sm:$0x3] }
  0x8e   : > { %3946 = vmatprep.mubr.msk.f32.mxu1 %vm379_vm2, %v4657_v25 }
  0x90   : > { %3997 = vmatmul.mubr.msk.f32.gmra.mxu0 %vm379_vm2, %v6198_v41  ;;  %v5234_v41 = vld [vmem:[%s4464_s9 + $0x188] sm:$0xff] }
  0x91   : > { %3947 = vmatmul.mubr.msk.f32.gmra.mxu1 %vm379_vm2, %v4660_v30  ;;  %3999 = vmatprep.mubr.msk.f32.mxu0 %vm379_vm2, %v6199_v50  ;;  %v6200_v50 = vld [vmem:[#allocation5_spill] sm:$0xff] }
  0x92   : > { %3949 = vmatprep.mubr.msk.f32.mxu1 %vm379_vm2, %v4701_v59 }
  0x94   : > { %4000 = vmatmul.mubr.msk.f32.gmra.mxu0 %vm379_vm2, %v4795_v22  ;;  %v6201_v22 = vld [vmem:[#allocation6_spill] sm:$0xff] }
  0x95   : > { %3950 = vmatmul.mubr.msk.f32.gmra.mxu1 %vm379_vm2, %v4704_v1  ;;  %4002 = vmatprep.mubr.msk.f32.mxu0 %vm379_vm2, %v4805_v7  ;;  %v6202_v7 = vld [vmem:[#allocation8_spill] sm:$0xff] }
  0x96   : > { %3952 = vmatprep.mubr.msk.f32.mxu1 %vm379_vm2, %v4745_v24 }
  0x98   : > { %4003 = vmatmul.mubr.msk.f32.gmra.mxu0 %vm379_vm2, %v4820_v29  ;;  %v6203_v29 = vld [vmem:[#allocation10_spill] sm:$0xff] }
  0x99   : > { %3953 = vmatmul.mubr.msk.f32.gmra.mxu1 %vm379_vm2, %v4748_v40  ;;  %4005 = vmatprep.mubr.msk.f32.mxu0 %vm379_vm2, %v6200_v50  ;;  %v6204_v50 = vld [vmem:[#allocation12_spill] sm:$0xff] }
  0x9a   : > { %3955 = vmatprep.mubr.msk.f32.mxu1 %vm379_vm2, %v4473_v5 }
  0x9c   : > { %4006 = vmatmul.mubr.msk.f32.gmra.mxu0 %vm379_vm2, %v6201_v22  ;;  %v6205_v22 = vld [vmem:[#allocation14_spill] sm:$0xff] }
  0x9d   : > { %3956 = vmatmul.mubr.msk.f32.gmra.mxu1 %vm379_vm2, %v4478_v8  ;;  %4008 = vmatprep.mubr.msk.f32.mxu0 %vm379_vm2, %v6202_v7  ;;  %v6206_v7 = vld [vmem:[#allocation16_spill] sm:$0xff] }
  0x9e   : > { %3958 = vmatprep.mubr.msk.f32.mxu1 %vm379_vm2, %v4499_v19 }
  0xa0   : > { %4009 = vmatmul.mubr.msk.f32.gmra.mxu0 %vm379_vm2, %v6203_v29  ;;  %v6207_v29 = vld [vmem:[#allocation18_spill] sm:$0xff] }
  0xa1   : > { %3959 = vmatmul.mubr.msk.f32.gmra.mxu1 %vm379_vm2, %v4502_v20  ;;  %4011 = vmatprep.mubr.msk.f32.mxu0 %vm379_vm2, %v6204_v50  ;;  %v6208_v50 = vld [vmem:[#allocation20_spill] sm:$0xff] }
  0xa2   : > { %3961 = vmatprep.mubr.msk.f32.mxu1 %vm379_vm2, %v4543_v35 }
  0xa4   : > { %4012 = vmatmul.mubr.msk.f32.gmra.mxu0 %vm379_vm2, %v6205_v22  ;;  %v6209_v22 = vld [vmem:[#allocation23_spill] sm:$0xff] }
  0xa5   : > { %3962 = vmatmul.mubr.msk.f32.gmra.mxu1 %vm379_vm2, %v4554_v39  ;;  %4014 = vmatprep.mubr.msk.f32.mxu0 %vm379_vm2, %v6206_v7  ;;  %v6210_v7 = vld [vmem:[#allocation25_spill] sm:$0xff] }
  0xa6   : > { %3964 = vmatprep.mubr.msk.f32.mxu1 %vm379_vm2, %v4591_v53 }
  0xa8   : > { %4015 = vmatmul.mubr.msk.f32.gmra.mxu0 %vm379_vm2, %v6207_v29  ;;  %v5231_v29 = vld [vmem:[%s4464_s9 + $0x180] sm:$0xff] }
  0xa9   : > { %3965 = vmatmul.mubr.msk.f32.gmra.mxu1 %vm379_vm2, %v4594_v54  ;;  %4017 = vmatprep.mubr.msk.f32.mxu0 %vm379_vm2, %v6208_v50  ;;  %v6211_v50 = vld [vmem:[#allocation28_spill] sm:$0xff] }
  0xaa   : > { %3967 = vmatprep.mubr.msk.f32.mxu1 %vm379_vm2, %v4630_v2 }
  0xac   : > { %4018 = vmatmul.mubr.msk.f32.gmra.mxu0 %vm379_vm2, %v6209_v22  ;;  %v1638_v22 = vrot.slane %v5234_v41, 1 }
  0xad   : > { %3968 = vmatmul.mubr.msk.f32.gmra.mxu1 %vm379_vm2, %v4633_v6  ;;  %4020 = vmatprep.mubr.msk.f32.mxu0 %vm379_vm2, %v6210_v7  ;;  %v1637_v7 = vrot.slane %v5231_v29, 1 }
  0xae   : > { %3970 = vmatprep.mubr.msk.f32.mxu1 %vm379_vm2, %v4665_v31 }
  0xb0   : > { %4021 = vmatmul.mubr.msk.f32.gmra.mxu0 %vm379_vm2, %v6211_v50  ;;  %v5259_v50 = vsel %vm298_vm1, %v1637_v7, %v1638_v22 }
  0xb1   : > { %3971 = vmatmul.mubr.msk.f32.gmra.mxu1 %vm379_vm2, %v4668_v32  ;;  %4023 = vmatprep.mubr.msk.f32.mxu0 %vm379_vm2, %v4781_v44  ;;  %v1640_v44 = vrot.slane %v5247_v52, 1  ;;  %6212 = vst [vmem:[#allocation26_spill] sm:$0xff] %v5259_v50 }
  0xb2   : > { %3973 = vmatprep.mubr.msk.f32.mxu1 %vm379_vm2, %v4709_v11 }
  0xb4   : > { %4024 = vmatmul.mubr.msk.f32.gmra.mxu0 %vm379_vm2, %v4802_v62  ;;  %v5268_v62 = vsel %vm298_vm1, %v1638_v22, %v1640_v44  ;;  %v6224_v22 = vld [vmem:[#allocation47_spill] sm:$0xff] }
  0xb5   : > { %3974 = vmatmul.mubr.msk.f32.gmra.mxu1 %vm379_vm2, %v6186_v0  ;;  %4026 = vmatprep.mubr.msk.f32.mxu0 %vm379_vm2, %v4810_v43  ;;  %6213 = vst [vmem:[#allocation7_spill] sm:$0xff] %v5268_v62 }
  0xb6   : > { %3976 = vmatprep.mubr.msk.f32.mxu1 %vm379_vm2, %v4753_v51 }
  0xb8   : > { %4027 = vmatmul.mubr.msk.f32.gmra.mxu0 %vm379_vm2, %v4825_v36  ;;  %v5445_v36 = vld [vmem:[%s4464_s9 + $0x198] sm:$0xff] }
  0xb9   : > { %3977 = vmatmul.mubr.msk.f32.gmra.mxu1 %vm379_vm2, %v6187_v16  ;;  %4029 = vmatprep.mubr.msk.f32.mxu0 %vm379_vm2, %v5259_v50 }
  0xba   : > { %3979 = vmatprep.mubr.msk.f32.mxu1 %vm379_vm2, %v5231_v29 }
  0xbc   : > { %4030 = vmatmul.mubr.msk.f32.gmra.mxu0 %vm379_vm2, %v5268_v62 }
  0xbd   : > { %3980 = vmatmul.mubr.msk.f32.gmra.mxu1 %vm379_vm2, %v5234_v41  ;;  %4084 = vmatprep.mubr.msk.f32.mxu0 %vm379_vm2, %v4537_v33  ;;  %v6214_v33 = vld [vmem:[#allocation37_spill] sm:$0xff] }
  0xbe   : > { %4034 = vmatprep.mubr.msk.f32.mxu1 %vm379_vm2, %v4843_v18 }
  0xc0   : > { %4085 = vmatmul.mubr.msk.f32.vlgmr.msra.gmra.mxu0 %vm379_vm2, %v4540_v34  ;;  %v6215_v34 = vld [vmem:[#allocation38_spill] sm:$0xff] }
  0xc1   : > { %4035 = vmatmul.mubr.msk.f32.vlgmr.msra.gmra.mxu1 %vm379_vm2, %v4855_v3  ;;  %4183 = vmatpush3.msk.msra.mxu0 %vm444_vm0, %v5130_v27 }
  0xc2   : > { %4133 = vmatpush3.msk.msra.mxu1 %vm444_vm0, %v5121_v57  ;;  %4037 = vmatprep.mubr.msk.f32.mxu1 %vm379_vm2, %v4868_v4  ;;  %v1906_v57 = vrot.slane %v5231_v29, 2 }
  0xc3   : > { %4087 = vmatprep.mubr.msk.f32.mxu0 %vm379_vm2, %v4577_v47  ;;  %v6216_v47 = vld [vmem:[#allocation39_spill] sm:$0xff] }
  0xc4   : > { %4088 = vmatmul.mubr.msk.f32.gmra.mxu0 %vm379_vm2, %v4580_v48  ;;  %v6217_v48 = vld [vmem:[#allocation40_spill] sm:$0xff] }
  0xc5   : > { %4038 = vmatmul.mubr.msk.f32.gmra.mxu1 %vm379_vm2, %v4885_v21  ;;  %4090 = vmatprep.mubr.msk.f32.mxu0 %vm379_vm2, %v4597_v55  ;;  %v6218_v55 = vld [vmem:[#allocation41_spill] sm:$0xff] }
  0xc6   : > { %4040 = vmatprep.mubr.msk.f32.mxu1 %vm379_vm2, %v4891_v10 }
  0xc8   : > { %4091 = vmatmul.mubr.msk.f32.gmra.mxu0 %vm379_vm2, %v4613_v61 }
  0xc9   : > { %4041 = vmatmul.mubr.msk.f32.gmra.mxu1 %vm379_vm2, %v4902_v60  ;;  %4093 = vmatprep.mubr.msk.f32.mxu0 %vm379_vm2, %v4657_v25  ;;  %v6220_v25 = vld [vmem:[#allocation43_spill] sm:$0xff] }
  0xca   : > { %4043 = vmatprep.mubr.msk.f32.mxu1 %vm379_vm2, %v4908_v49 }
  0xcc   : > { %4094 = vmatmul.mubr.msk.f32.gmra.mxu0 %vm379_vm2, %v4660_v30  ;;  %v6221_v30 = vld [vmem:[#allocation44_spill] sm:$0xff] }
  0xcd   : > { %4044 = vmatmul.mubr.msk.f32.gmra.mxu1 %vm379_vm2, %v6214_v33  ;;  %4096 = vmatprep.mubr.msk.f32.mxu0 %vm379_vm2, %v4701_v59 }
  0xce   : > { %4046 = vmatprep.mubr.msk.f32.mxu1 %vm379_vm2, %v4925_v12 }
  0xd0   : > { %4097 = vmatmul.mubr.msk.f32.gmra.mxu0 %vm379_vm2, %v4704_v1 }
  0xd1   : > { %4047 = vmatmul.mubr.msk.f32.gmra.mxu1 %vm379_vm2, %v6215_v34  ;;  %4099 = vmatprep.mubr.msk.f32.mxu0 %vm379_vm2, %v4745_v24  ;;  %v6222_v24 = vld [vmem:[#allocation45_spill] sm:$0xff] }
  0xd2   : > { %4049 = vmatprep.mubr.msk.f32.mxu1 %vm379_vm2, %v4942_v37 }
  0xd4   : > { %4100 = vmatmul.mubr.msk.f32.gmra.mxu0 %vm379_vm2, %v4748_v40  ;;  %v6223_v40 = vld [vmem:[#allocation46_spill] sm:$0xff] }
  0xd5   : > { %4050 = vmatmul.mubr.msk.f32.gmra.mxu1 %vm379_vm2, %v6216_v47  ;;  %4102 = vmatprep.mubr.msk.f32.mxu0 %vm379_vm2, %v4473_v5 }
  0xd6   : > { %4052 = vmatprep.mubr.msk.f32.mxu1 %vm379_vm2, %v4959_v28 }
  0xd8   : > { %4103 = vmatmul.mubr.msk.f32.gmra.mxu0 %vm379_vm2, %v4478_v8 }
  0xd9   : > { %4053 = vmatmul.mubr.msk.f32.gmra.mxu1 %vm379_vm2, %v6217_v48  ;;  %4105 = vmatprep.mubr.msk.f32.mxu0 %vm379_vm2, %v4499_v19  ;;  %v6219_v19 = vld [vmem:[#allocation42_spill] sm:$0xff] }
  0xda   : > { %4055 = vmatprep.mubr.msk.f32.mxu1 %vm379_vm2, %v4976_v45 }
  0xdc   : > { %4106 = vmatmul.mubr.msk.f32.gmra.mxu0 %vm379_vm2, %v4502_v20 }
  0xdd   : > { %4056 = vmatmul.mubr.msk.f32.gmra.mxu1 %vm379_vm2, %v6218_v55  ;;  %4108 = vmatprep.mubr.msk.f32.mxu0 %vm379_vm2, %v4543_v35 }
  0xde   : > { %4058 = vmatprep.mubr.msk.f32.mxu1 %vm379_vm2, %v4993_v26 }
  0xe0   : > { %v5348_v5 = vpop.f32.mrf.mxu0  ;;  %4109 = vmatmul.mubr.msk.f32.gmra.mxu0 %vm379_vm2, %v4554_v39 }
  0xe1   : > { %v5352_v8 = vpop.f32.mrf.mxu1  ;;  %4059 = vmatmul.mubr.msk.f32.gmra.mxu1 %vm379_vm2, %v6219_v19  ;;  %4111 = vmatprep.mubr.msk.f32.mxu0 %vm379_vm2, %v4591_v53 }
  0xe2   : > { %v5358_v20 = vpop.f32.mrf.mxu0  ;;  %4061 = vmatprep.mubr.msk.f32.mxu1 %vm379_vm2, %v5010_v42 }
  0xe3   : > { %v5362_v35 = vpop.f32.mrf.mxu1 }
  0xe4   : > { %v5364_v61 = vpop.f32.mrf.mxu0  ;;  %4112 = vmatmul.mubr.msk.f32.gmra.mxu0 %vm379_vm2, %v4594_v54 }
  0xe5   : > { %v5368_v39 = vpop.f32.mrf.mxu1  ;;  %4062 = vmatmul.mubr.msk.f32.gmra.mxu1 %vm379_vm2, %v6220_v25  ;;  %4114 = vmatprep.mubr.msk.f32.mxu0 %vm379_vm2, %v4630_v2 }
  0xe6   : > { %v5374_v53 = vpop.f32.mrf.mxu0  ;;  %4064 = vmatprep.mubr.msk.f32.mxu1 %vm379_vm2, %v6221_v30 }
  0xe7   : > { %v5378_v59 = vpop.f32.mrf.mxu1 }
  0xe8   : > { %v5380_v1 = vpop.f32.mrf.mxu0  ;;  %4115 = vmatmul.mubr.msk.f32.gmra.mxu0 %vm379_vm2, %v4633_v6 }
  0xe9   : > { %v5384_v54 = vpop.f32.mrf.mxu1  ;;  %4065 = vmatmul.mubr.msk.f32.gmra.mxu1 %vm379_vm2, %v6222_v24  ;;  %4117 = vmatprep.mubr.msk.f32.mxu0 %vm379_vm2, %v4665_v31 }
  0xea   : > { %v5390_v2 = vpop.f32.mrf.mxu0  ;;  %4067 = vmatprep.mubr.msk.f32.mxu1 %vm379_vm2, %v6223_v40 }
  0xeb   : > { %v5394_v7 = vpop.f32.mrf.mxu1 }
  0xec   : > { %v5396_v44 = vpop.f32.mrf.mxu0  ;;  %4118 = vmatmul.mubr.msk.f32.gmra.mxu0 %vm379_vm2, %v4668_v32 }
  0xed   : > { %v5400_v6 = vpop.f32.mrf.mxu1  ;;  %4068 = vmatmul.mubr.msk.f32.gmra.mxu1 %vm379_vm2, %v6224_v22  ;;  %4120 = vmatprep.mubr.msk.f32.mxu0 %vm379_vm2, %v4709_v11 }
  0xee   : > { %v5406_v31 = vpop.f32.mrf.mxu0  ;;  %4070 = vmatprep.mubr.msk.f32.mxu1 %vm379_vm2, %v5061_v38 }
  0xef   : > { %v5410_v18 = vpop.f32.mrf.mxu1 }
  0xf0   : > { %v5412_v3 = vpop.f32.mrf.mxu0  ;;  %4121 = vmatmul.mubr.msk.f32.gmra.mxu0 %vm379_vm2, %v6186_v0  ;;  %v1907_v0 = vrot.slane %v5234_v41, 2 }
  0xf1   : > { %v5416_v32 = vpop.f32.mrf.mxu1  ;;  %4071 = vmatmul.mubr.msk.f32.gmra.mxu1 %vm379_vm2, %v5072_v58  ;;  %4123 = vmatprep.mubr.msk.f32.mxu0 %vm379_vm2, %v4753_v51 }
  0xf2   : > { %6225 = vst [vmem:[#allocation9_spill] sm:$0xff] %v5416_v32  ;;  %v5422_v11 = vpop.f32.mrf.mxu0  ;;  %4073 = vmatprep.mubr.msk.f32.mxu1 %vm379_vm2, %v5078_v56  ;;  %v5464_v32 = vld [vmem:[%s4464_s9 + $0x1a0] sm:$0xff] }
  0xf3   : > { %v5427_v27 = vpop.f32.mrf.mxu1 }
  0xf4   : > { %6226 = vst [vmem:[#allocation11_spill] sm:$0xff] %v5427_v27  ;;  %v5430_v62 = vpop.f32.mrf.mxu0  ;;  %4124 = vmatmul.mubr.msk.f32.gmra.mxu0 %vm379_vm2, %v6187_v16  ;;  %v1909_v27 = vrot.slane %v5247_v52, 2  ;;  %v5451_v16 = vsel %vm965_vm3, %v1906_v57, %v1907_v0 }
  0xf5   : > { %v5434_v50 = vpop.f32.mrf.mxu1  ;;  %4074 = vmatmul.mubr.msk.f32.gmra.mxu1 %vm379_vm2, %v5089_v63  ;;  %4126 = vmatprep.mubr.msk.f32.mxu0 %vm379_vm2, %v5231_v29  ;;  %6229 = vst [vmem:[#allocation17_spill] sm:$0xff] %v5451_v16 }
  0xf6   : > { %6227 = vst [vmem:[#allocation13_spill] sm:$0xff] %v5434_v50  ;;  %v5440_v51 = vpop.f32.mrf.mxu0  ;;  %4076 = vmatprep.mubr.msk.f32.mxu1 %vm379_vm2, %v5095_v13  ;;  %v5471_v57 = vsel %vm965_vm3, %v1907_v0, %v1909_v27 }
  0xf7   : > { %v5448_v43 = vpop.f32.mrf.mxu1  ;;  %6231 = vst [vmem:[#allocation37_spill] sm:$0xff] %v5471_v57 }
  0xf8   : > { %6228 = vst [vmem:[#allocation15_spill] sm:$0xff] %v5448_v43  ;;  %v5453_v50 = vpop.f32.mrf.mxu0  ;;  %4127 = vmatmul.mubr.msk.f32.gmra.mxu0 %vm379_vm2, %v5234_v41 }
  0xf9   : > { %v5457_v29 = vpop.f32.mrf.mxu1  ;;  %4077 = vmatmul.mubr.msk.f32.gmra.mxu1 %vm379_vm2, %v5104_v15  ;;  %4129 = vmatprep.mubr.msk.f32.mxu0 %vm379_vm2, %v5445_v36 }
  0xfa   : > { %6230 = vst [vmem:[#allocation22_spill] sm:$0xff] %v5457_v29  ;;  %v5466_v52 = vpop.f32.mrf.mxu0  ;;  %4079 = vmatprep.mubr.msk.f32.mxu1 %vm379_vm2, %v5451_v16 }
  0xfb   : > { %v5473_v43 = vpop.f32.mrf.mxu1 }
  0xfc   : > { %6232 = vst [vmem:[#allocation38_spill] sm:$0xff] %v5473_v43  ;;  %v5475_v41 = vpop.f32.mrf.mxu0  ;;  %4130 = vmatmul.mubr.msk.f32.gmra.mxu0 %vm379_vm2, %v5464_v32 }
  0xfd   : > { %v5479_v29 = vpop.f32.mrf.mxu1  ;;  %4080 = vmatmul.mubr.msk.f32.gmra.mxu1 %vm379_vm2, %v5471_v57  ;;  %4184 = vmatprep.mubr.msk.f32.mxu0 %vm379_vm2, %v4868_v4 }
  0xfe   : > { %6233 = vst [vmem:[#allocation39_spill] sm:$0xff] %v5479_v29  ;;  %v5485_v15 = vpop.f32.mrf.mxu0  ;;  %4134 = vmatprep.mubr.msk.f32.mxu1 %vm379_vm2, %v6191_v14 }
  0xff   : > { %v5489_v27 = vpop.f32.mrf.mxu1 }
 0x100   : > { %6234 = vst [vmem:[#allocation40_spill] sm:$0xff] %v5489_v27  ;;  %v3886_v0 = vpop.f32.mrf.mxu0  ;;  %4185 = vmatmul.mubr.msk.f32.vlgmr.msra.gmra.mxu0 %vm379_vm2, %v4885_v21 }
 0x101   : > { %v3836_v43 = vpop.f32.mrf.mxu1  ;;  %4135 = vmatmul.mubr.msk.f32.vlgmr.msra.gmra.mxu1 %vm379_vm2, %v6192_v17  ;;  %4187 = vmatprep.mubr.msk.f32.mxu0 %vm379_vm2, %v4891_v10 }
 0x102   : > { %v812_v4 = vadd.f32 %v3836_v43, %v5348_v5  ;;  %v1179_v29 = vpop.f32.mrf.mxu0  ;;  %4137 = vmatprep.mubr.msk.f32.mxu1 %vm379_vm2, %v6193_v23  ;;  %v6235_v23 = vld [vmem:[#allocation19_spill] sm:$0xff] }
 0x103   : > { %v806_v14 = vpop.f32.mrf.mxu1 }
 0x104   : > { %v5500_v57 = vadd.f32 %v3886_v0, %v812_v4  ;;  %v807_v27 = vadd.f32 %v806_v14, %v5358_v20  ;;  %v3889_v16 = vpop.f32.mrf.mxu0  ;;  %4188 = vmatmul.mubr.msk.f32.gmra.mxu0 %vm379_vm2, %v4902_v60  ;;  %v6237_v14 = vld [vmem:[#allocation27_spill] sm:$0xff] }
 0x105   : > { %v3839_v21 = vpop.f32.mrf.mxu1  ;;  %4138 = vmatmul.mubr.msk.f32.gmra.mxu1 %vm379_vm2, %v6194_v9  ;;  %4190 = vmatprep.mubr.msk.f32.mxu0 %vm379_vm2, %v4908_v49 }
 0x106   : > { %v5509_v43 = vadd.f32 %v1179_v29, %v807_v27  ;;  %v822_v10 = vadd.f32 %v3839_v21, %v5364_v61  ;;  %v1189_v17 = vpop.f32.mrf.mxu0  ;;  %4140 = vmatprep.mubr.msk.f32.mxu1 %vm379_vm2, %v6235_v23 }
 0x107   : > { %v816_v5 = vpop.f32.mrf.mxu1 }
 0x108   : > { %v5514_v20 = vadd.f32 %v3889_v16, %v822_v10  ;;  %v817_v60 = vadd.f32 %v816_v5, %v5374_v53  ;;  %v3892_v0 = vpop.f32.mrf.mxu0  ;;  %4191 = vmatmul.mubr.msk.f32.gmra.mxu0 %vm379_vm2, %v6214_v33  ;;  %v6236_v16 = vld [vmem:[#allocation24_spill] sm:$0xff]  ;;  %v6238_v10 = vld [vmem:[#allocation29_spill] sm:$0xff] }
 0x109   : > { %v3842_v9 = vpop.f32.mrf.mxu1  ;;  %4141 = vmatmul.mubr.msk.f32.gmra.mxu1 %vm379_vm2, %v6196_v46  ;;  %4193 = vmatprep.mubr.msk.f32.mxu0 %vm379_vm2, %v4925_v12 }
 0x10a   : > { %v5523_v49 = vadd.f32 %v1189_v17, %v817_v60  ;;  %v832_v61 = vadd.f32 %v3842_v9, %v5380_v1  ;;  %v1199_v29 = vpop.f32.mrf.mxu0  ;;  %4143 = vmatprep.mubr.msk.f32.mxu1 %vm379_vm2, %v6236_v16  ;;  %v6239_v60 = vld [vmem:[#allocation31_spill] sm:$0xff]  ;;  %v6240_v9 = vld [vmem:[#allocation33_spill] sm:$0xff] }
 0x10b   : > { %v826_v53 = vpop.f32.mrf.mxu1 }
 0x10c   : > { %v5528_v27 = vadd.f32 %v3892_v0, %v832_v61  ;;  %v827_v33 = vadd.f32 %v826_v53, %v5390_v2  ;;  %v3895_v4 = vpop.f32.mrf.mxu0  ;;  %4194 = vmatmul.mubr.msk.f32.gmra.mxu0 %vm379_vm2, %v6215_v34  ;;  %v6241_v53 = vld [vmem:[#allocation35_spill] sm:$0xff] }
 0x10d   : > { %v3845_v46 = vpop.f32.mrf.mxu1  ;;  %4144 = vmatmul.mubr.msk.f32.gmra.mxu1 %vm379_vm2, %v6237_v14  ;;  %4196 = vmatprep.mubr.msk.f32.mxu0 %vm379_vm2, %v4942_v37 }
 0x10e   : > { %v5537_v12 = vadd.f32 %v1199_v29, %v827_v33  ;;  %v842_v1 = vadd.f32 %v3845_v46, %v5396_v44  ;;  %v1209_v21 = vpop.f32.mrf.mxu0  ;;  %4146 = vmatprep.mubr.msk.f32.mxu1 %vm379_vm2, %v6238_v10 }
 0x10f   : > { %v836_v2 = vpop.f32.mrf.mxu1 }
 0x110   : > { %v5542_v17 = vadd.f32 %v3895_v4, %v842_v1  ;;  %v837_v34 = vadd.f32 %v836_v2, %v5406_v31  ;;  %v3898_v23 = vpop.f32.mrf.mxu0  ;;  %4197 = vmatmul.mubr.msk.f32.gmra.mxu0 %vm379_vm2, %v6216_v47  ;;  %v6242_v4 = vld [vmem:[#allocation5_spill] sm:$0xff]  ;;  %v6244_v2 = vld [vmem:[#allocation8_spill] sm:$0xff] }
 0x111   : > { %v3848_v5 = vpop.f32.mrf.mxu1  ;;  %4147 = vmatmul.mubr.msk.f32.gmra.mxu1 %vm379_vm2, %v6239_v60  ;;  %4199 = vmatprep.mubr.msk.f32.mxu0 %vm379_vm2, %v4959_v28  ;;  %v6245_v60 = vld [vmem:[#allocation10_spill] sm:$0xff] }
 0x112   : > { %v5551_v37 = vadd.f32 %v1209_v21, %v837_v34  ;;  %v852_v44 = vadd.f32 %v3848_v5, %v5412_v3  ;;  %v1219_v0 = vpop.f32.mrf.mxu0  ;;  %4149 = vmatprep.mubr.msk.f32.mxu1 %vm379_vm2, %v6240_v9  ;;  %v6243_v21 = vld [vmem:[#allocation6_spill] sm:$0xff] }
 0x113   : > { %v846_v31 = vpop.f32.mrf.mxu1 }
 0x114   : > { %v5556_v61 = vadd.f32 %v3898_v23, %v852_v44  ;;  %v847_v47 = vadd.f32 %v846_v31, %v5422_v11  ;;  %v3901_v29 = vpop.f32.mrf.mxu0  ;;  %4200 = vmatmul.mubr.msk.f32.gmra.mxu0 %vm379_vm2, %v6217_v48 }
 0x115   : > { %v3851_v16 = vpop.f32.mrf.mxu1  ;;  %4150 = vmatmul.mubr.msk.f32.gmra.mxu1 %vm379_vm2, %v6241_v53  ;;  %4202 = vmatprep.mubr.msk.f32.mxu0 %vm379_vm2, %v4976_v45  ;;  %v6248_v53 = vld [vmem:[#allocation16_spill] sm:$0xff] }
 0x116   : > { %v5565_v28 = vadd.f32 %v1219_v0, %v847_v47  ;;  %v862_v3 = vadd.f32 %v3851_v16, %v5430_v62  ;;  %v1229_v33 = vpop.f32.mrf.mxu0  ;;  %4152 = vmatprep.mubr.msk.f32.mxu1 %vm379_vm2, %v6242_v4  ;;  %v6246_v0 = vld [vmem:[#allocation12_spill] sm:$0xff] }
 0x117   : > { %v856_v11 = vpop.f32.mrf.mxu1 }
 0x118   : > { %v5570_v46 = vadd.f32 %v3901_v29, %v862_v3  ;;  %v857_v48 = vadd.f32 %v856_v11, %v5440_v51  ;;  %v3904_v14 = vpop.f32.mrf.mxu0  ;;  %4203 = vmatmul.mubr.msk.f32.gmra.mxu0 %vm379_vm2, %v6218_v55  ;;  %v6247_v29 = vld [vmem:[#allocation14_spill] sm:$0xff] }
 0x119   : > { %v3854_v1 = vpop.f32.mrf.mxu1  ;;  %4153 = vmatmul.mubr.msk.f32.gmra.mxu1 %vm379_vm2, %v6243_v21  ;;  %4205 = vmatprep.mubr.msk.f32.mxu0 %vm379_vm2, %v4993_v26  ;;  %v6249_v11 = vld [vmem:[#allocation18_spill] sm:$0xff] }
 0x11a   : > { %v5579_v62 = vadd.f32 %v1229_v33, %v857_v48  ;;  %v872_v45 = vadd.f32 %v3854_v1, %v5453_v50  ;;  %v1239_v10 = vpop.f32.mrf.mxu0  ;;  %4155 = vmatprep.mubr.msk.f32.mxu1 %vm379_vm2, %v6244_v2 }
 0x11b   : > { %v866_v51 = vpop.f32.mrf.mxu1 }
 0x11c   : > { %v5584_v34 = vadd.f32 %v3904_v14, %v872_v45  ;;  %v867_v55 = vadd.f32 %v866_v51, %v5466_v52  ;;  %v3907_v23 = vpop.f32.mrf.mxu0  ;;  %4206 = vmatmul.mubr.msk.f32.gmra.mxu0 %vm379_vm2, %v6219_v19  ;;  %v6250_v14 = vld [vmem:[#allocation20_spill] sm:$0xff]  ;;  %v6252_v51 = vld [vmem:[#allocation25_spill] sm:$0xff] }
 0x11d   : > { %v3857_v5 = vpop.f32.mrf.mxu1  ;;  %4156 = vmatmul.mubr.msk.f32.gmra.mxu1 %vm379_vm2, %v6245_v60  ;;  %4208 = vmatprep.mubr.msk.f32.mxu0 %vm379_vm2, %v5010_v42  ;;  %v6253_v60 = vld [vmem:[#allocation28_spill] sm:$0xff] }
 0x11e   : > { %v5593_v26 = vadd.f32 %v1239_v10, %v867_v55  ;;  %v882_v50 = vadd.f32 %v3857_v5, %v5475_v41  ;;  %v1249_v44 = vpop.f32.mrf.mxu0  ;;  %4158 = vmatprep.mubr.msk.f32.mxu1 %vm379_vm2, %v6246_v0  ;;  %v6251_v10 = vld [vmem:[#allocation23_spill] sm:$0xff] }
 0x11f   : > { %v876_v52 = vpop.f32.mrf.mxu1 }
 0x120   : > { %v5598_v9 = vadd.f32 %v3907_v23, %v882_v50  ;;  %v877_v19 = vadd.f32 %v876_v52, %v5485_v15  ;;  %v3910_v31 = vpop.f32.mrf.mxu0  ;;  %4209 = vmatmul.mubr.msk.f32.gmra.mxu0 %vm379_vm2, %v6220_v25 }
 0x121   : > { %v3860_v47 = vpop.f32.mrf.mxu1  ;;  %4159 = vmatmul.mubr.msk.f32.gmra.mxu1 %vm379_vm2, %v6247_v29  ;;  %4211 = vmatprep.mubr.msk.f32.mxu0 %vm379_vm2, %v6221_v30  ;;  %v6256_v29 = vld [vmem:[#allocation9_spill] sm:$0xff] }
 0x122   : > { %v5607_v42 = vadd.f32 %v1249_v44, %v877_v19  ;;  %v892_v41 = vadd.f32 %v3860_v47, %v5352_v8  ;;  %v1259_v16 = vpop.f32.mrf.mxu0  ;;  %4161 = vmatprep.mubr.msk.f32.mxu1 %vm379_vm2, %v6248_v53  ;;  %v6254_v44 = vld [vmem:[#allocation30_spill] sm:$0xff]  ;;  %v2443_v53 = vrot.slane %v5464_v32, 1 }
 0x123   : > { %v886_v15 = vpop.f32.mrf.mxu1 }
 0x124   : > { %v5612_v3 = vadd.f32 %v3910_v31, %v892_v41  ;;  %v887_v25 = vadd.f32 %v886_v15, %v5362_v35  ;;  %v3913_v33 = vpop.f32.mrf.mxu0  ;;  %4212 = vmatmul.mubr.msk.f32.gmra.mxu0 %vm379_vm2, %v6222_v24  ;;  %v2712_v31 = vrot.slane %v5464_v32, 2  ;;  %v6262_v32 = vld [vmem:[#allocation13_spill] sm:$0xff] }
 0x125   : > { %v3863_v4 = vpop.f32.mrf.mxu1  ;;  %4162 = vmatmul.mubr.msk.f32.gmra.mxu1 %vm379_vm2, %v6249_v11  ;;  %4214 = vmatprep.mubr.msk.f32.mxu0 %vm379_vm2, %v6223_v40 }
 0x126   : > { %v5621_v8 = vadd.f32 %v1259_v16, %v887_v25  ;;  %v902_v30 = vadd.f32 %v3863_v4, %v5368_v39  ;;  %v1269_v48 = vpop.f32.mrf.mxu0  ;;  %4164 = vmatprep.mubr.msk.f32.mxu1 %vm379_vm2, %v6250_v14  ;;  %v6257_v16 = vld [vmem:[#allocation34_spill] sm:$0xff]  ;;  %v6260_v14 = vld [vmem:[#allocation36_spill] sm:$0xff] }
 0x127   : > { %v896_v35 = vpop.f32.mrf.mxu1  ;;  %v240_v25 = vld [vmem:[%s4464_s9 + $0x1a8] sm:$0x3]  ;;  %s177_s9 = scalar_lea.vmem [#allocation2], %s3179_s8 }
 0x128   : > { %v5626_v1 = vadd.f32 %v3913_v33, %v902_v30  ;;  %v897_v24 = vadd.f32 %v896_v35, %v5378_v59  ;;  %v3916_v21 = vpop.f32.mrf.mxu0  ;;  %4215 = vmatmul.mubr.msk.f32.gmra.mxu0 %vm379_vm2, %v6224_v22  ;;  %v6259_v30 = vld [vmem:[#allocation21_spill] sm:$0xff]  ;;  %s3102_s10 = sshll.u32 %s177_s9, 4  ;;  %s6012_s10 = int_to_ptr.vmem [resolvable:$true] %s3102_s10 }
 0x129   : > { %v3866_v45 = vpop.f32.mrf.mxu1  ;;  %4165 = vmatmul.mubr.msk.f32.gmra.mxu1 %vm379_vm2, %v6251_v10  ;;  %4217 = vmatprep.mubr.msk.f32.mxu0 %vm379_vm2, %v5061_v38  ;;  %v6261_v35 = vld [vmem:[#allocation17_spill] sm:$0xff]  ;;  %v6263_v10 = vld [vmem:[#allocation26_spill] sm:$0xff]  ;;  %s4290_s26 = scalar_lea.vmem %s6012_s10, 256  ;;  %p4297_p1 = scmp.lt.s32.totalorder %s6012_s10, %s4295_s28 }
 0x12a   : > { %v5635_v39 = vadd.f32 %v1269_v48, %v897_v24  ;;  %v912_v40 = vadd.f32 %v3866_v45, %v5384_v54  ;;  %v1279_v2 = vpop.f32.mrf.mxu0  ;;  %4167 = vmatprep.mubr.msk.f32.mxu1 %vm379_vm2, %v6252_v51  ;;  %p4291_p12 = scmp.ne.s32.totalorder %s6012_s10, %s4290_s26  ;;  %p4298_p2 = scmp.lt.s32.totalorder %s4296_s15, %s4290_s26 }
 0x12b   : > { %v906_v59 = vpop.f32.mrf.mxu1 }
 0x12c   : > { %v5640_v55 = vadd.f32 %v3916_v21, %v912_v40  ;;  %v907_v22 = vadd.f32 %v906_v59, %v5394_v7  ;;  %v3919_v23 = vpop.f32.mrf.mxu0  ;;  %4218 = vmatmul.mubr.msk.f32.gmra.mxu0 %vm379_vm2, %v5072_v58  ;;  %v2445_v40 = vrot.slane %v240_v25, 1  ;;  %p4292_p13 = pnand %p4291_p12, %p4429_p4  ;;  %p4299_p3 = por %p4298_p2, %p4297_p1 }
 0x12d   : > { %v3869_v5 = vpop.f32.mrf.mxu1  ;;  %4168 = vmatmul.mubr.msk.f32.gmra.mxu1 %vm379_vm2, %v6253_v60  ;;  %4220 = vmatprep.mubr.msk.f32.mxu0 %vm379_vm2, %v5078_v56  ;;  %v6255_v56 = vld [vmem:[#allocation32_spill] sm:$0xff] }
 0x12e   : > { %v5649_v38 = vadd.f32 %v1279_v2, %v907_v22  ;;  %v922_v54 = vadd.f32 %v3869_v5, %v5400_v6  ;;  %v1289_v50 = vpop.f32.mrf.mxu0  ;;  %4170 = vmatprep.mubr.msk.f32.mxu1 %vm379_vm2, %v6254_v44  ;;  %v2711_v6 = vrot.slane %v5445_v36, 2  ;;  %v6266_v44 = vld [vmem:[#allocation7_spill] sm:$0xff]  ;;  %p4293_p0 = pneg %p4292_p13 }
 0x12f   : > { %v916_v7 = vpop.f32.mrf.mxu1 }
 0x130   : > { %v5654_v0 = vadd.f32 %v3919_v23, %v922_v54  ;;  %v917_v58 = vadd.f32 %v916_v7, %v5410_v18  ;;  %v3922_v52 = vpop.f32.mrf.mxu0  ;;  %4221 = vmatmul.mubr.msk.f32.gmra.mxu0 %vm379_vm2, %v5089_v63  ;;  %v2442_v63 = vrot.slane %v5445_v36, 1  ;;  %v2714_v36 = vrot.slane %v240_v25, 2  ;;  %v6264_v23 = vld [vmem:[#allocation15_spill] sm:$0xff]  ;;  %v6265_v54 = vld [vmem:[#allocation37_spill] sm:$0xff]  ;;  %p4300_p5 = pnand %p4299_p3, %p4293_p0 }
 0x131   : > { %v3872_v19 = vpop.f32.mrf.mxu1  ;;  %4171 = vmatmul.mubr.msk.f32.gmra.mxu1 %vm379_vm2, %v6255_v56  ;;  %4223 = vmatprep.mubr.msk.f32.mxu0 %vm379_vm2, %v5095_v13  ;;  %v6258_v13 = vld [vmem:[#allocation11_spill] sm:$0xff]  ;;  %v2713_v2 = vsel %vm965_vm3, %v2711_v6, %v2712_v31  ;;  %v2446_v6 = vsel %vm298_vm1, %v2443_v53, %v2445_v40 }
 0x132   : > { %v5665_v47 = vadd.f32 %v1289_v50, %v917_v58  ;;  %v932_v41 = vadd.f32 %v3872_v19, %v6256_v29  ;;  %v1299_v18 = vpop.f32.mrf.mxu0  ;;  %4173 = vmatprep.mubr.msk.f32.mxu1 %vm379_vm2, %v6257_v16  ;;  %v2444_v59 = vsel %vm298_vm1, %v2442_v63, %v2443_v53  ;;  %v2715_v7 = vsel %vm965_vm3, %v2712_v31, %v2714_v36  ;;  %v6269_v25 = vld [vmem:[#allocation39_spill] sm:$0xff]  ;;  %v6270_v53 = vld [vmem:[#allocation40_spill] sm:$0xff] }
 0x133   : > { %v926_v15 = vpop.f32.mrf.mxu1 }
 0x134   : > { %v5673_v33 = vadd.f32 %v3922_v52, %v932_v41  ;;  %v927_v4 = vadd.f32 %v926_v15, %v6258_v13  ;;  %v3925_v11 = vpop.f32.mrf.mxu0  ;;  %4224 = vmatmul.mubr.msk.f32.gmra.mxu0 %vm379_vm2, %v6259_v30  ;;  %v6267_v52 = vld [vmem:[#allocation22_spill] sm:$0xff] }
 0x135   : > { %v3875_v48 = vpop.f32.mrf.mxu1  ;;  %4174 = vmatmul.mubr.msk.f32.gmra.mxu1 %vm379_vm2, %v6260_v14  ;;  %4226 = vmatprep.mubr.msk.f32.mxu0 %vm379_vm2, %v6261_v35 }
 0x136   : > { %v5682_v24 = vadd.f32 %v1299_v18, %v927_v4  ;;  %v942_v21 = vadd.f32 %v3875_v48, %v6262_v32  ;;  %v1309_v45 = vpop.f32.mrf.mxu0  ;;  %4176 = vmatprep.mubr.msk.f32.mxu1 %vm379_vm2, %v6263_v10  ;;  %v6268_v18 = vld [vmem:[#allocation38_spill] sm:$0xff] }
 0x137   : > { %v936_v51 = vpop.f32.mrf.mxu1 }
 0x138   : > { %v5689_v22 = vadd.f32 %v3925_v11, %v942_v21  ;;  %v937_v5 = vadd.f32 %v936_v51, %v6264_v23  ;;  %v3928_v60 = vpop.f32.mrf.mxu0  ;;  %4227 = vmatmul.mubr.msk.f32.gmra.mxu0 %vm379_vm2, %v6265_v54 }
 0x139   : > { %v3878_v50 = vpop.f32.mrf.mxu1  ;;  %4177 = vmatmul.mubr.msk.f32.gmra.mxu1 %vm379_vm2, %v6266_v44  ;;  %4229 = vmatprep.mubr.msk.f32.mxu0 %vm379_vm2, %v2713_v2 }
 0x13a   : > { %v5698_v58 = vadd.f32 %v1309_v45, %v937_v5  ;;  %v952_v19 = vadd.f32 %v3878_v50, %v6267_v52  ;;  %v1319_v56 = vpop.f32.mrf.mxu0  ;;  %4179 = vmatprep.mubr.msk.f32.mxu1 %vm379_vm2, %v2444_v59 }
 0x13b   : > { %v946_v29 = vpop.f32.mrf.mxu1 }
 0x13c   : > { %v5703_v41 = vadd.f32 %v3928_v60, %v952_v19  ;;  %v947_v16 = vadd.f32 %v946_v29, %v6268_v18  ;;  %v3931_v63 = vpop.f32.mrf.mxu0  ;;  %4230 = vmatmul.mubr.msk.f32.gmra.mxu0 %vm379_vm2, %v2715_v7 }
 0x13d   : > { %v3881_v15 = vpop.f32.mrf.mxu1  ;;  %4180 = vmatmul.mubr.msk.f32.gmra.mxu1 %vm379_vm2, %v2446_v6 }
 0x13e   : > { %v5708_v31 = vadd.f32 %v1319_v56, %v947_v16  ;;  %v962_v13 = vadd.f32 %v3881_v15, %v6269_v25  ;;  %v1329_v4 = vpop.f32.mrf.mxu0 }
 0x13f   : > { %v956_v11 = vpop.f32.mrf.mxu1 }
 0x140   : > { %v5711_v30 = vadd.f32 %v3931_v63, %v962_v13  ;;  %v957_v48 = vadd.f32 %v956_v11, %v6270_v53  ;;  %v3986_v14 = vpop.f32.mrf.mxu0 }
 0x141   : > { %v3936_v35 = vpop.f32.mrf.mxu1 }
 0x142   : > { %v5714_v36 = vadd.f32 %v1329_v4, %v957_v48  ;;  %v1605_v32 = vadd.f32 %v3936_v35, %v5500_v57  ;;  %v1715_v21 = vpop.f32.mrf.mxu0 }
 0x143   : > { %v1445_v45 = vpop.f32.mrf.mxu1 }
 0x144   : > { %v5717_v10 = vadd.f32 %v3986_v14, %v1605_v32  ;;  %v1604_v40 = vadd.f32 %v1445_v45, %v5509_v43  ;;  %v3989_v2 = vpop.f32.mrf.mxu0 }
 0x145   : > { %v3939_v51 = vpop.f32.mrf.mxu1 }
 0x146   : > { %v5720_v59 = vadd.f32 %v1715_v21, %v1604_v40  ;;  %v1607_v23 = vadd.f32 %v3939_v51, %v5514_v20  ;;  %v1725_v5 = vpop.f32.mrf.mxu0 }
 0x147   : > { %v1455_v60 = vpop.f32.mrf.mxu1 }
 0x148   : > { %v5723_v54 = vadd.f32 %v3989_v2, %v1607_v23  ;;  %v1606_v50 = vadd.f32 %v1455_v60, %v5523_v49  ;;  %v3992_v44 = vpop.f32.mrf.mxu0 }
 0x149   : > { %v3942_v57 = vpop.f32.mrf.mxu1 }
 0x14a   : > { %v5726_v7 = vadd.f32 %v1725_v5, %v1606_v50  ;;  %v1609_v52 = vadd.f32 %v3942_v57, %v5528_v27  ;;  %v1735_v19 = vpop.f32.mrf.mxu0 }
 0x14b   : > { %v1465_v43 = vpop.f32.mrf.mxu1 }
 0x14c   : > { %v5729_v56 = vadd.f32 %v3992_v44, %v1609_v52  ;;  %v1608_v6 = vadd.f32 %v1465_v43, %v5537_v12  ;;  %v3995_v29 = vpop.f32.mrf.mxu0 }
 0x14d   : > { %v3945_v20 = vpop.f32.mrf.mxu1 }
 0x14e   : > { %v5732_v18 = vadd.f32 %v1735_v19, %v1608_v6  ;;  %v1611_v16 = vadd.f32 %v3945_v20, %v5542_v17  ;;  %v1745_v63 = vpop.f32.mrf.mxu0 }
 0x14f   : > { %v1475_v49 = vpop.f32.mrf.mxu1 }
 0x150   : > { %v5735_v15 = vadd.f32 %v3995_v29, %v1611_v16  ;;  %v1610_v25 = vadd.f32 %v1475_v49, %v5551_v37  ;;  %v3998_v13 = vpop.f32.mrf.mxu0 }
 0x151   : > { %v3948_v27 = vpop.f32.mrf.mxu1 }
 0x152   : > { %v5738_v4 = vadd.f32 %v1745_v63, %v1610_v25  ;;  %v1613_v11 = vadd.f32 %v3948_v27, %v5556_v61  ;;  %v1755_v53 = vpop.f32.mrf.mxu0 }
 0x153   : > { %v1485_v12 = vpop.f32.mrf.mxu1 }
 0x154   : > { %v5741_v48 = vadd.f32 %v3998_v13, %v1613_v11  ;;  %v1612_v14 = vadd.f32 %v1485_v12, %v5565_v28  ;;  %v4001_v35 = vpop.f32.mrf.mxu0 }
 0x155   : > { %v3951_v17 = vpop.f32.mrf.mxu1 }
 0x156   : > { %v5744_v32 = vadd.f32 %v1755_v53, %v1612_v14  ;;  %v1615_v21 = vadd.f32 %v3951_v17, %v5570_v46  ;;  %v1765_v45 = vpop.f32.mrf.mxu0 }
 0x157   : > { %v1495_v37 = vpop.f32.mrf.mxu1 }
 0x158   : > { %v5747_v40 = vadd.f32 %v4001_v35, %v1615_v21  ;;  %v1614_v2 = vadd.f32 %v1495_v37, %v5579_v62  ;;  %v4004_v51 = vpop.f32.mrf.mxu0 }
 0x159   : > { %v3954_v61 = vpop.f32.mrf.mxu1 }
 0x15a   : > { %v5750_v23 = vadd.f32 %v1765_v45, %v1614_v2  ;;  %v1617_v5 = vadd.f32 %v3954_v61, %v5584_v34  ;;  %v1775_v60 = vpop.f32.mrf.mxu0 }
 0x15b   : > { %v1505_v28 = vpop.f32.mrf.mxu1 }
 0x15c   : > { %v5753_v50 = vadd.f32 %v4004_v51, %v1617_v5  ;;  %v1616_v44 = vadd.f32 %v1505_v28, %v5593_v26  ;;  %v4007_v57 = vpop.f32.mrf.mxu0 }
 0x15d   : > { %v3957_v46 = vpop.f32.mrf.mxu1 }
 0x15e   : > { %v5756_v52 = vadd.f32 %v1775_v60, %v1616_v44  ;;  %v1619_v19 = vadd.f32 %v3957_v46, %v5598_v9  ;;  %v1785_v43 = vpop.f32.mrf.mxu0 }
 0x15f   : > { %v1515_v62 = vpop.f32.mrf.mxu1 }
 0x160   : > { %v5759_v6 = vadd.f32 %v4007_v57, %v1619_v19  ;;  %v1618_v29 = vadd.f32 %v1515_v62, %v5607_v42  ;;  %v4010_v20 = vpop.f32.mrf.mxu0 }
 0x161   : > { %v3960_v34 = vpop.f32.mrf.mxu1 }
 0x162   : > { %v5762_v16 = vadd.f32 %v1785_v43, %v1618_v29  ;;  %v1621_v63 = vadd.f32 %v3960_v34, %v5612_v3  ;;  %v1795_v49 = vpop.f32.mrf.mxu0 }
 0x163   : > { %v1525_v26 = vpop.f32.mrf.mxu1 }
 0x164   : > { %v5765_v25 = vadd.f32 %v4010_v20, %v1621_v63  ;;  %v1620_v13 = vadd.f32 %v1525_v26, %v5621_v8  ;;  %v4013_v27 = vpop.f32.mrf.mxu0 }
 0x165   : > { %v3963_v9 = vpop.f32.mrf.mxu1 }
 0x166   : > { %v5768_v11 = vadd.f32 %v1795_v49, %v1620_v13  ;;  %v1623_v53 = vadd.f32 %v3963_v9, %v5626_v1  ;;  %v1805_v12 = vpop.f32.mrf.mxu0 }
 0x167   : > { %v1535_v42 = vpop.f32.mrf.mxu1 }
 0x168   : > { %v5771_v14 = vadd.f32 %v4013_v27, %v1623_v53  ;;  %v1622_v35 = vadd.f32 %v1535_v42, %v5635_v39  ;;  %v4016_v17 = vpop.f32.mrf.mxu0 }
 0x169   : > { %v3966_v3 = vpop.f32.mrf.mxu1 }
 0x16a   : > { %v5774_v21 = vadd.f32 %v1805_v12, %v1622_v35  ;;  %v1625_v45 = vadd.f32 %v3966_v3, %v5640_v55  ;;  %v1815_v37 = vpop.f32.mrf.mxu0 }
 0x16b   : > { %v1545_v8 = vpop.f32.mrf.mxu1 }
 0x16c   : > { %v5777_v2 = vadd.f32 %v4016_v17, %v1625_v45  ;;  %v1624_v51 = vadd.f32 %v1545_v8, %v5649_v38  ;;  %v4019_v61 = vpop.f32.mrf.mxu0 }
 0x16d   : > { %v3969_v1 = vpop.f32.mrf.mxu1 }
 0x16e   : > { %v5780_v5 = vadd.f32 %v1815_v37, %v1624_v51  ;;  %v1627_v60 = vadd.f32 %v3969_v1, %v5654_v0  ;;  %v1825_v28 = vpop.f32.mrf.mxu0 }
 0x16f   : > { %v1555_v39 = vpop.f32.mrf.mxu1 }
 0x170   : > { %v5783_v44 = vadd.f32 %v4019_v61, %v1627_v60  ;;  %v1626_v57 = vadd.f32 %v1555_v39, %v5665_v47  ;;  %v4022_v46 = vpop.f32.mrf.mxu0 }
 0x171   : > { %v3972_v55 = vpop.f32.mrf.mxu1 }
 0x172   : > { %v5786_v19 = vadd.f32 %v1825_v28, %v1626_v57  ;;  %v1629_v43 = vadd.f32 %v3972_v55, %v5673_v33  ;;  %v1835_v62 = vpop.f32.mrf.mxu0 }
 0x173   : > { %v1565_v38 = vpop.f32.mrf.mxu1 }
 0x174   : > { %v5789_v29 = vadd.f32 %v4022_v46, %v1629_v43  ;;  %v1628_v20 = vadd.f32 %v1565_v38, %v5682_v24  ;;  %v4025_v34 = vpop.f32.mrf.mxu0 }
 0x175   : > { %v3975_v0 = vpop.f32.mrf.mxu1 }
 0x176   : > { %v5792_v63 = vadd.f32 %v1835_v62, %v1628_v20  ;;  %v1631_v49 = vadd.f32 %v3975_v0, %v5689_v22  ;;  %v1845_v26 = vpop.f32.mrf.mxu0 }
 0x177   : > { %v1575_v47 = vpop.f32.mrf.mxu1 }
 0x178   : > { %v5795_v13 = vadd.f32 %v4025_v34, %v1631_v49  ;;  %v1630_v27 = vadd.f32 %v1575_v47, %v5698_v58  ;;  %v4028_v9 = vpop.f32.mrf.mxu0 }
 0x179   : > { %v3978_v33 = vpop.f32.mrf.mxu1 }
 0x17a   : > { %v5798_v53 = vadd.f32 %v1845_v26, %v1630_v27  ;;  %v1633_v12 = vadd.f32 %v3978_v33, %v5703_v41  ;;  %v1855_v42 = vpop.f32.mrf.mxu0 }
 0x17b   : > { %v1585_v24 = vpop.f32.mrf.mxu1 }
 0x17c   : > { %v5801_v35 = vadd.f32 %v4028_v9, %v1633_v12  ;;  %v1632_v17 = vadd.f32 %v1585_v24, %v5708_v31  ;;  %v4031_v3 = vpop.f32.mrf.mxu0 }
 0x17d   : > { %v3981_v22 = vpop.f32.mrf.mxu1 }
 0x17e   : > { %v5804_v45 = vadd.f32 %v1855_v42, %v1632_v17  ;;  %v1635_v37 = vadd.f32 %v3981_v22, %v5711_v30  ;;  %v1865_v8 = vpop.f32.mrf.mxu0 }
 0x17f   : > { %v1595_v58 = vpop.f32.mrf.mxu1 }
 0x180   : > { %v5807_v51 = vadd.f32 %v4031_v3, %v1635_v37  ;;  %v1634_v61 = vadd.f32 %v1595_v58, %v5714_v36  ;;  %v4086_v1 = vpop.f32.mrf.mxu0 }
 0x181   : > { %v4036_v41 = vpop.f32.mrf.mxu1 }
 0x182   : > { %v5810_v60 = vadd.f32 %v1865_v8, %v1634_v61  ;;  %v2144_v28 = vadd.f32 %v4036_v41, %v5717_v10  ;;  %v5813_v39 = vpop.f32.mrf.mxu0 }
 0x183   : > { %v5815_v31 = vpop.f32.mrf.mxu1 }
 0x184   : > { %v5817_v57 = vadd.f32 %v4086_v1, %v2144_v28  ;;  %v4089_v46 = vpop.f32.mrf.mxu0 }
 0x185   : > { %v4039_v30 = vpop.f32.mrf.mxu1 }
 0x186   : > { %v2146_v55 = vadd.f32 %v4039_v30, %v5723_v54  ;;  %v2260_v43 = vpop.f32.mrf.mxu0 }
 0x187   : > { %v1994_v62 = vpop.f32.mrf.mxu1 }
 0x188   : > { %v5820_v38 = vadd.f32 %v4089_v46, %v2146_v55  ;;  %v2145_v36 = vadd.f32 %v1994_v62, %v5726_v7  ;;  %v4092_v20 = vpop.f32.mrf.mxu0 }
 0x189   : > { %v4042_v34 = vpop.f32.mrf.mxu1 }
 0x18a   : > { %v5823_v0 = vadd.f32 %v2260_v43, %v2145_v36  ;;  %v2148_v10 = vadd.f32 %v4042_v34, %v5729_v56  ;;  %v2270_v49 = vpop.f32.mrf.mxu0 }
 0x18b   : > { %v2004_v26 = vpop.f32.mrf.mxu1 }
 0x18c   : > { %v5826_v47 = vadd.f32 %v4092_v20, %v2148_v10  ;;  %v2147_v27 = vadd.f32 %v2004_v26, %v5732_v18  ;;  %v4095_v9 = vpop.f32.mrf.mxu0 }
 0x18d   : > { %v4045_v54 = vpop.f32.mrf.mxu1 }
 0x18e   : > { %v5829_v33 = vadd.f32 %v2270_v49, %v2147_v27  ;;  %v2150_v12 = vadd.f32 %v4045_v54, %v5735_v15  ;;  %v2280_v42 = vpop.f32.mrf.mxu0 }
 0x18f   : > { %v2014_v7 = vpop.f32.mrf.mxu1 }
 0x190   : > { %v5832_v24 = vadd.f32 %v4095_v9, %v2150_v12  ;;  %v2149_v17 = vadd.f32 %v2014_v7, %v5738_v4  ;;  %v4098_v3 = vpop.f32.mrf.mxu0 }
 0x191   : > { %v4048_v56 = vpop.f32.mrf.mxu1 }
 0x192   : > { %v5835_v22 = vadd.f32 %v2280_v42, %v2149_v17  ;;  %v2152_v37 = vadd.f32 %v4048_v56, %v5741_v48  ;;  %v2290_v8 = vpop.f32.mrf.mxu0 }
 0x193   : > { %v2024_v18 = vpop.f32.mrf.mxu1 }
 0x194   : > { %v5838_v58 = vadd.f32 %v4098_v3, %v2152_v37  ;;  %v2151_v61 = vadd.f32 %v2024_v18, %v5744_v32  ;;  %v4101_v1 = vpop.f32.mrf.mxu0 }
 0x195   : > { %v4051_v15 = vpop.f32.mrf.mxu1 }
 0x196   : > { %v5841_v41 = vadd.f32 %v2290_v8, %v2151_v61  ;;  %v2154_v28 = vadd.f32 %v4051_v15, %v5747_v40  ;;  %v2300_v46 = vpop.f32.mrf.mxu0 }
 0x197   : > { %v2034_v4 = vpop.f32.mrf.mxu1 }
 0x198   : > { %v5844_v30 = vadd.f32 %v4101_v1, %v2154_v28  ;;  %v2153_v55 = vadd.f32 %v2034_v4, %v5750_v23  ;;  %v4104_v43 = vpop.f32.mrf.mxu0 }
 0x199   : > { %v4054_v48 = vpop.f32.mrf.mxu1 }
 0x19a   : > { %v5847_v62 = vadd.f32 %v2300_v46, %v2153_v55  ;;  %v2156_v36 = vadd.f32 %v4054_v48, %v5753_v50  ;;  %v2310_v20 = vpop.f32.mrf.mxu0 }
 0x19b   : > { %v2044_v32 = vpop.f32.mrf.mxu1 }
 0x19c   : > { %v5850_v34 = vadd.f32 %v4104_v43, %v2156_v36  ;;  %v2155_v10 = vadd.f32 %v2044_v32, %v5756_v52  ;;  %v4107_v49 = vpop.f32.mrf.mxu0 }
 0x19d   : > { %v4057_v40 = vpop.f32.mrf.mxu1 }
 0x19e   : > { %v5853_v26 = vadd.f32 %v2310_v20, %v2155_v10  ;;  %v2158_v27 = vadd.f32 %v4057_v40, %v5759_v6  ;;  %v2320_v9 = vpop.f32.mrf.mxu0 }
 0x19f   : > { %v2054_v23 = vpop.f32.mrf.mxu1 }
 0x1a0   : > { %v5856_v54 = vadd.f32 %v4107_v49, %v2158_v27  ;;  %v2157_v12 = vadd.f32 %v2054_v23, %v5762_v16  ;;  %v4110_v42 = vpop.f32.mrf.mxu0 }
 0x1a1   : > { %v4060_v50 = vpop.f32.mrf.mxu1 }
 0x1a2   : > { %v5859_v7 = vadd.f32 %v2320_v9, %v2157_v12  ;;  %v2160_v17 = vadd.f32 %v4060_v50, %v5765_v25  ;;  %v5862_v3 = vpop.f32.mrf.mxu0 }
 0x1a3   : > { %v5864_v52 = vpop.f32.mrf.mxu1 }
 0x1a4   : > { %v5866_v56 = vadd.f32 %v4110_v42, %v2160_v17  ;;  %v4113_v37 = vpop.f32.mrf.mxu0 }
 0x1a5   : > { %v4063_v6 = vpop.f32.mrf.mxu1 }
 0x1a6   : > { %v2162_v8 = vadd.f32 %v4063_v6, %v5771_v14  ;;  %v2340_v18 = vpop.f32.mrf.mxu0 }
 0x1a7   : > { %v2074_v61 = vpop.f32.mrf.mxu1 }
 0x1a8   : > { %v5869_v1 = vadd.f32 %v4113_v37, %v2162_v8  ;;  %v2161_v16 = vadd.f32 %v2074_v61, %v5774_v21  ;;  %v4116_v15 = vpop.f32.mrf.mxu0 }
 0x1a9   : > { %v4066_v28 = vpop.f32.mrf.mxu1 }
 0x1aa   : > { %v5872_v46 = vadd.f32 %v2340_v18, %v2161_v16  ;;  %v2164_v25 = vadd.f32 %v4066_v28, %v5777_v2  ;;  %v2350_v4 = vpop.f32.mrf.mxu0 }
 0x1ab   : > { %v2084_v55 = vpop.f32.mrf.mxu1 }
 0x1ac   : > { %v5875_v43 = vadd.f32 %v4116_v15, %v2164_v25  ;;  %v2163_v48 = vadd.f32 %v2084_v55, %v5780_v5  ;;  %v4119_v36 = vpop.f32.mrf.mxu0 }
 0x1ad   : > { %v4069_v14 = vpop.f32.mrf.mxu1 }
 0x1ae   : > { %v5878_v20 = vadd.f32 %v2350_v4, %v2163_v48  ;;  %v2166_v32 = vadd.f32 %v4069_v14, %v5783_v44  ;;  %v2360_v10 = vpop.f32.mrf.mxu0 }
 0x1af   : > { %v2094_v21 = vpop.f32.mrf.mxu1 }
 0x1b0   : > { %v5881_v49 = vadd.f32 %v4119_v36, %v2166_v32  ;;  %v2165_v40 = vadd.f32 %v2094_v21, %v5786_v19  ;;  %v4122_v27 = vpop.f32.mrf.mxu0  ;;  %v2143_v36 = vadd.f32 %v5815_v31, %v5720_v59 }
 0x1b1   : > { %v4072_v2 = vpop.f32.mrf.mxu1 }
 0x1b2   : > { %v5884_v9 = vadd.f32 %v2360_v10, %v2165_v40  ;;  %v2168_v23 = vadd.f32 %v4072_v2, %v5789_v29  ;;  %v2370_v12 = vpop.f32.mrf.mxu0  ;;  %v2409_v2 = vadd.f32 %v5813_v39, %v2143_v36 }
 0x1b3   : > { %v2104_v5 = vpop.f32.mrf.mxu1 }
 0x1b4   : > { %v5887_v42 = vadd.f32 %v4122_v27, %v2168_v23  ;;  %v2167_v50 = vadd.f32 %v2104_v5, %v5792_v63  ;;  %v4125_v17 = vpop.f32.mrf.mxu0 }
 0x1b5   : > { %v4075_v44 = vpop.f32.mrf.mxu1 }
 0x1b6   : > { %v5890_v37 = vadd.f32 %v2370_v12, %v2167_v50  ;;  %v2170_v6 = vadd.f32 %v4075_v44, %v5795_v13  ;;  %v2380_v8 = vpop.f32.mrf.mxu0 }
 0x1b7   : > { %v2114_v19 = vpop.f32.mrf.mxu1 }
 0x1b8   : > { %v5893_v18 = vadd.f32 %v4125_v17, %v2170_v6  ;;  %v2169_v61 = vadd.f32 %v2114_v19, %v5798_v53  ;;  %v4128_v16 = vpop.f32.mrf.mxu0 }
 0x1b9   : > { %v4078_v29 = vpop.f32.mrf.mxu1 }
 0x1ba   : > { %v5896_v15 = vadd.f32 %v2380_v8, %v2169_v61  ;;  %v2172_v28 = vadd.f32 %v4078_v29, %v5801_v35  ;;  %v2390_v25 = vpop.f32.mrf.mxu0 }
 0x1bb   : > { %v2124_v63 = vpop.f32.mrf.mxu1 }
 0x1bc   : > { %v5899_v4 = vadd.f32 %v4128_v16, %v2172_v28  ;;  %v2171_v55 = vadd.f32 %v2124_v63, %v5804_v45  ;;  %v4131_v48 = vpop.f32.mrf.mxu0 }
 0x1bd   : > { %v4081_v13 = vpop.f32.mrf.mxu1 }
 0x1be   : > { %v5904_v14 = vadd.f32 %v2390_v25, %v2171_v55  ;;  %v2174_v53 = vadd.f32 %v4081_v13, %v5807_v51  ;;  %v2400_v32 = vpop.f32.mrf.mxu0 }
 0x1bf   : > { %v2134_v10 = vpop.f32.mrf.mxu1 }
 0x1c0   : > { %v5907_v21 = vadd.f32 %v4131_v48, %v2174_v53  ;;  %v2173_v35 = vadd.f32 %v2134_v10, %v5810_v60  ;;  %v4186_v40 = vpop.f32.mrf.mxu0  ;;  %v5917_v60 = vld [vmem:[%s6057_s2] ss:$0 sm:$0xff] }
 0x1c1   : > { %v4136_v27 = vpop.f32.mrf.mxu1 }
 0x1c2   : > { %v5911_v45 = vadd.f32 %v2400_v32, %v2173_v35  ;;  %v2789_v23 = vpop.f32.mrf.mxu0  ;;  %v2680_v59 = vadd.f32 %v4136_v27, %v5817_v57 }
 0x1c3   : > { %v2520_v12 = vpop.f32.mrf.mxu1 }
 0x1c4   : > { %v2679_v31 = vadd.f32 %v2520_v12, %v2409_v2  ;;  %v4189_v5 = vpop.f32.mrf.mxu0  ;;  %v2949_v6 = vadd.f32 %v4186_v40, %v2680_v59 }
 0x1c5   : > { %v4139_v50 = vpop.f32.mrf.mxu1 }
 0x1c6   : > { %v2948_v51 = vadd.f32 %v2789_v23, %v2679_v31  ;;  %v2799_v17 = vpop.f32.mrf.mxu0  ;;  %v2682_v29 = vadd.f32 %v4139_v50, %v5820_v38  ;;  %v2988_v63 = vadd.f32 %v5917_v60, %v2949_v6 }
 0x1c7   : > { %v2530_v44 = vpop.f32.mrf.mxu1 }
 0x1c8   : > { %v2681_v39 = vadd.f32 %v2530_v44, %v5823_v0  ;;  %v4192_v8 = vpop.f32.mrf.mxu0  ;;  %v2987_v19 = vadd.f32 %v5917_v60, %v2948_v51  ;;  %v2951_v36 = vadd.f32 %v4189_v5, %v2682_v29 }
 0x1c9   : > { %v4142_v61 = vpop.f32.mrf.mxu1 }
 0x1ca   : > { %3019 = vxpose.xlu0.b32.start [1/16] (narrow) %v2987_v19, 8  ;;  %v2809_v57 = vpop.f32.mrf.mxu0  ;;  %v2950_v28 = vadd.f32 %v2799_v17, %v2681_v39  ;;  %v2684_v38 = vadd.f32 %v4142_v61, %v5826_v47  ;;  %v2990_v23 = vadd.f32 %v5917_v60, %v2951_v36 }
 0x1cb   : > { %v2540_v16 = vpop.f32.mrf.mxu1 }
 0x1cc   : > { %v4195_v25 = vpop.f32.mrf.mxu0  ;;  %v2683_v0 = vadd.f32 %v2540_v16, %v5829_v33  ;;  %v2989_v32 = vadd.f32 %v5917_v60, %v2950_v28  ;;  %v2953_v5 = vadd.f32 %v4192_v8, %v2684_v38 }
 0x1cd   : > { %v4145_v55 = vpop.f32.mrf.mxu1 }
 0x1ce   : > { %3020 = vxpose.xlu0.b32.cont [2/16] (narrow) %v2988_v63, 8  ;;  %v2819_v48 = vpop.f32.mrf.mxu0  ;;  %v2952_v27 = vadd.f32 %v2809_v57, %v2683_v0  ;;  %v2686_v6 = vadd.f32 %v4145_v55, %v5832_v24  ;;  %v2992_v61 = vadd.f32 %v5917_v60, %v2953_v5 }
 0x1cf   : > { %v2550_v13 = vpop.f32.mrf.mxu1 }
 0x1d0   : > { %v4198_v53 = vpop.f32.mrf.mxu0  ;;  %v2685_v33 = vadd.f32 %v2550_v13, %v5835_v22  ;;  %v2991_v51 = vadd.f32 %v5917_v60, %v2952_v27  ;;  %v2159_v22 = vadd.f32 %v5864_v52, %v5768_v11  ;;  %v2955_v29 = vadd.f32 %v4195_v25, %v2686_v6 }
 0x1d1   : > { %v4148_v10 = vpop.f32.mrf.mxu1 }
 0x1d2   : > { %3021 = vxpose.xlu0.b32.cont [3/16] (narrow) %v2989_v32, 8  ;;  %v2829_v35 = vpop.f32.mrf.mxu0  ;;  %v2954_v39 = vadd.f32 %v2819_v48, %v2685_v33  ;;  %v2425_v48 = vadd.f32 %v5862_v3, %v2159_v22  ;;  %v2688_v36 = vadd.f32 %v4148_v10, %v5838_v58  ;;  %v2994_v38 = vadd.f32 %v5917_v60, %v2955_v29 }
 0x1d3   : > { %v2560_v40 = vpop.f32.mrf.mxu1 }
 0x1d4   : > { %v5926_v2 = vpop.f32.mrf.mxu0  ;;  %v2687_v28 = vadd.f32 %v2560_v40, %v5841_v41  ;;  %v2993_v24 = vadd.f32 %v5917_v60, %v2954_v39 }
 0x1d5   : > { %v4151_v12 = vpop.f32.mrf.mxu1 }
 0x1d6   : > { %3022 = vxpose.xlu0.b32.cont [4/16] (narrow) %v2990_v23, 8  ;;  %v2839_v59 = vpop.f32.mrf.mxu0  ;;  %v2956_v11 = vadd.f32 %v2829_v35, %v2687_v28  ;;  %v2957_v23 = vadd.f32 %v4198_v53, %v2688_v36  ;;  %v2690_v39 = vadd.f32 %v4151_v12, %v5844_v30 }
 0x1d7   : > { %v2570_v31 = vpop.f32.mrf.mxu1 }
 0x1d8   : > { %v5930_v50 = vpop.f32.mrf.mxu0  ;;  %v2689_v5 = vadd.f32 %v2570_v31, %v5847_v62  ;;  %v2995_v58 = vadd.f32 %v5917_v60, %v2956_v11  ;;  %v2996_v53 = vadd.f32 %v5917_v60, %v2957_v23 }
 0x1d9   : > { %v5933_v17 = vpop.f32.mrf.mxu1 }
 0x1da   : > { %3023 = vxpose.xlu0.b32.cont [5/16] (narrow) %v2991_v51, 8  ;;  %v5935_v47 = vpop.f32.mrf.mxu0  ;;  %v2958_v22 = vadd.f32 %v2839_v59, %v2689_v5  ;;  %v2692_v36 = vadd.f32 %v5933_v17, %v5850_v34 }
 0x1db   : > { %v2580_v44 = vpop.f32.mrf.mxu1 }
 0x1dc   : > { %v5938_v19 = vpop.f32.mrf.mxu0  ;;  %v2997_v59 = vadd.f32 %v5917_v60, %v2958_v22  ;;  %v2961_v17 = vadd.f32 %v5930_v50, %v2692_v36 }
 0x1dd   : > { %v5941_v8 = vpop.f32.mrf.mxu1 }
 0x1de   : > { %3024 = vxpose.xlu0.b32.cont [6/16] (narrow) %v2992_v61, 8  ;;  %v5945_v57 = vpop.f32.mrf.mxu0 }
 0x1df   : > { %v5947_v16 = vpop.f32.mrf.mxu1 }
 0x1e0   : > { %v4210_v63 = vpop.f32.mrf.mxu0  ;;  %v2693_v23 = vadd.f32 %v5947_v16, %v5859_v7 }
 0x1e1   : > { %v4160_v55 = vpop.f32.mrf.mxu1 }
 0x1e2   : > { %3025 = vxpose.xlu0.b32.cont [7/16] (narrow) %v2993_v24, 8  ;;  %v2869_v13 = vpop.f32.mrf.mxu0  ;;  %v2696_v52 = vadd.f32 %v4160_v55, %v5866_v56  ;;  %v2959_v24 = vadd.f32 %v5926_v2, %v2690_v39  ;;  %v2691_v55 = vadd.f32 %v2580_v44, %v5853_v26 }
 0x1e3   : > { %v2600_v0 = vpop.f32.mrf.mxu1 }
 0x1e4   : > { %v2695_v32 = vadd.f32 %v2600_v0, %v2425_v48  ;;  %v4213_v25 = vpop.f32.mrf.mxu0  ;;  %v2965_v33 = vadd.f32 %v4210_v63, %v2696_v52  ;;  %v2960_v26 = vadd.f32 %v5935_v47, %v2691_v55 }
 0x1e5   : > { %v4163_v27 = vpop.f32.mrf.mxu1 }
 0x1e6   : > { %v2964_v41 = vadd.f32 %v2869_v13, %v2695_v32  ;;  %3026 = vxpose.xlu0.b32.cont [8/16] (narrow) %v2994_v38, 8  ;;  %v2879_v40 = vpop.f32.mrf.mxu0  ;;  %v2698_v62 = vadd.f32 %v4163_v27, %v5869_v1 }
 0x1e7   : > { %v2610_v3 = vpop.f32.mrf.mxu1 }
 0x1e8   : > { %v2697_v51 = vadd.f32 %v2610_v3, %v5872_v46  ;;  %v3003_v10 = vadd.f32 %v5917_v60, %v2964_v41  ;;  %v4216_v56 = vpop.f32.mrf.mxu0  ;;  %v3004_v46 = vadd.f32 %v5917_v60, %v2965_v33  ;;  %v2967_v12 = vadd.f32 %v4213_v25, %v2698_v62 }
 0x1e9   : > { %v4166_v35 = vpop.f32.mrf.mxu1  ;;  %v2999_v33 = vadd.f32 %v5917_v60, %v2960_v26 }
 0x1ea   : > { %3027 = vxpose.xlu0.b32.cont [9/16] (narrow) %v2995_v58, 8  ;;  %3051 = vxpose.xlu1.b32.start [1/16] (narrow) %v3003_v10, 8  ;;  %v2889_v6 = vpop.f32.mrf.mxu0  ;;  %v2966_v31 = vadd.f32 %v2879_v40, %v2697_v51  ;;  %v2700_v44 = vadd.f32 %v4166_v35, %v5875_v43  ;;  %v3006_v27 = vadd.f32 %v5917_v60, %v2967_v12 }
 0x1eb   : > { %v2620_v61 = vpop.f32.mrf.mxu1  ;;  %v2694_v35 = vadd.f32 %v5941_v8, %v5856_v54 }
 0x1ec   : > { %v5963_v29 = vpop.f32.mrf.mxu0  ;;  %v2699_v48 = vadd.f32 %v2620_v61, %v5878_v20  ;;  %v3005_v1 = vadd.f32 %v5917_v60, %v2966_v31  ;;  %v2998_v20 = vadd.f32 %v5917_v60, %v2959_v24  ;;  %v2969_v5 = vadd.f32 %v4216_v56, %v2700_v44 }
 0x1ed   : > { %v4169_v28 = vpop.f32.mrf.mxu1 }
 0x1ee   : > { %3028 = vxpose.xlu0.b32.cont [10/16] (narrow) %v2996_v53, 8  ;;  %3052 = vxpose.xlu1.b32.cont [2/16] (narrow) %v3004_v46, 8  ;;  %v2899_v63 = vpop.f32.mrf.mxu0  ;;  %v2968_v32 = vadd.f32 %v2889_v6, %v2699_v48  ;;  %v2702_v39 = vadd.f32 %v4169_v28, %v5881_v49  ;;  %v3000_v53 = vadd.f32 %v5917_v60, %v2961_v17 }
 0x1ef   : > { %v2630_v30 = vpop.f32.mrf.mxu1  ;;  %v3008_v22 = vadd.f32 %v5917_v60, %v2969_v5 }
 0x1f0   : > { %v4222_v13 = vpop.f32.mrf.mxu0  ;;  %v2971_v28 = vadd.f32 %v5963_v29, %v2702_v39 }
 0x1f1   : > { %v4172_v0 = vpop.f32.mrf.mxu1 }
 0x1f2   : > { %v2704_v11 = vadd.f32 %v4172_v0, %v5887_v42  ;;  %3029 = vxpose.xlu0.b32.cont [11/16] (narrow) %v2997_v59, 8  ;;  %3053 = vxpose.xlu1.b32.cont [3/16] (narrow) %v3005_v1, 8  ;;  %v2909_v2 = vpop.f32.mrf.mxu0 }
 0x1f3   : > { %v2640_v52 = vpop.f32.mrf.mxu1 }
 0x1f4   : > { %v2703_v38 = vadd.f32 %v2640_v52, %v5890_v37  ;;  %v2973_v25 = vadd.f32 %v4222_v13, %v2704_v11  ;;  %v4225_v34 = vpop.f32.mrf.mxu0  ;;  %v2701_v37 = vadd.f32 %v2630_v30, %v5884_v9 }
 0x1f5   : > { %v4175_v42 = vpop.f32.mrf.mxu1 }
 0x1f6   : > { %v2706_v41 = vadd.f32 %v4175_v42, %v5893_v18  ;;  %v2972_v40 = vadd.f32 %v2909_v2, %v2703_v38  ;;  %3030 = vxpose.xlu0.b32.cont [12/16] (narrow) %v2998_v20, 8  ;;  %3054 = vxpose.xlu1.b32.cont [4/16] (narrow) %v3006_v27, 8  ;;  %v2919_v47 = vpop.f32.mrf.mxu0  ;;  %v3012_v43 = vadd.f32 %v5917_v60, %v2973_v25 }
 0x1f7   : > { %v2650_v3 = vpop.f32.mrf.mxu1  ;;  %v3007_v18 = vadd.f32 %v5917_v60, %v2968_v32  ;;  %v2970_v62 = vadd.f32 %v2899_v63, %v2701_v37 }
 0x1f8   : > { %v2705_v50 = vadd.f32 %v2650_v3, %v5896_v15  ;;  %v2975_v51 = vadd.f32 %v4225_v34, %v2706_v41  ;;  %v4228_v58 = vpop.f32.mrf.mxu0  ;;  %v3011_v10 = vadd.f32 %v5917_v60, %v2972_v40  ;;  %v2962_v15 = vadd.f32 %v5945_v57, %v2693_v23 }
 0x1f9   : > { %v4178_v6 = vpop.f32.mrf.mxu1  ;;  %v2963_v57 = vadd.f32 %v5938_v19, %v2694_v35  ;;  %v3009_v59 = vadd.f32 %v5917_v60, %v2970_v62  ;;  %v3010_v19 = vadd.f32 %v5917_v60, %v2971_v28 }
 0x1fa   : > { %v2708_v7 = vadd.f32 %v4178_v6, %v5899_v4  ;;  %v2974_v16 = vadd.f32 %v2919_v47, %v2705_v50  ;;  %3031 = vxpose.xlu0.b32.cont [13/16] (narrow) %v2999_v33, 8  ;;  %3055 = vxpose.xlu1.b32.cont [5/16] (narrow) %v3007_v18, 8  ;;  %v2929_v9 = vpop.f32.mrf.mxu0  ;;  %v3014_v56 = vadd.f32 %v5917_v60, %v2975_v51 }
 0x1fb   : > { %v2660_v61 = vpop.f32.mrf.mxu1  ;;  %v3002_v29 = vadd.f32 %v5917_v60, %v2963_v57 }
 0x1fc   : > { %v2707_v54 = vadd.f32 %v2660_v61, %v5904_v14  ;;  %v2977_v8 = vadd.f32 %v4228_v58, %v2708_v7  ;;  %v4231_v4 = vpop.f32.mrf.mxu0  ;;  %v3013_v31 = vadd.f32 %v5917_v60, %v2974_v16  ;;  %v3001_v14 = vadd.f32 %v5917_v60, %v2962_v15 }
 0x1fd   : > { %v4181_v46 = vpop.f32.mrf.mxu1 }
 0x1fe   : > { %v2710_v24 = vadd.f32 %v4181_v46, %v5907_v21  ;;  %v2976_v55 = vadd.f32 %v2929_v9, %v2707_v54  ;;  %3032 = vxpose.xlu0.b32.cont [14/16] (narrow) %v3000_v53, 8  ;;  %3056 = vxpose.xlu1.b32.cont [6/16] (narrow) %v3008_v22, 8  ;;  %v3016_v49 = vadd.f32 %v5917_v60, %v2977_v8  ;;  %v2939_v63 = vpop.f32.mrf.mxu0 }
 0x1ff   : > { %v2670_v30 = vpop.f32.mrf.mxu1 }
 0x200   : > { %v2709_v12 = vadd.f32 %v2670_v30, %v5911_v45  ;;  %v2979_v48 = vadd.f32 %v4231_v4, %v2710_v24  ;;  %v3015_v21 = vadd.f32 %v5917_v60, %v2976_v55 }
 0x202   : > { %v2978_v1 = vadd.f32 %v2939_v63, %v2709_v12  ;;  %3057 = vxpose.xlu1.b32.cont [7/16] (narrow) %v3009_v59, 8  ;;  %3033 = vxpose.xlu0.b32.cont [15/16] (narrow) %v3001_v14, 8  ;;  %v3018_v13 = vadd.f32 %v5917_v60, %v2979_v48 }
 0x204   : > { %v3017_v36 = vadd.f32 %v5917_v60, %v2978_v1 }
 0x206   : > { %3058 = vxpose.xlu1.b32.cont [8/16] (narrow) %v3010_v19, 8  ;;  %3034 = vxpose.xlu0.b32.end [16/16] (narrow) %v3002_v29, 8 }
 0x20a   : > { %3059 = vxpose.xlu1.b32.cont [9/16] (narrow) %v3011_v10, 8 }
 0x20e   : > { %3060 = vxpose.xlu1.b32.cont [10/16] (narrow) %v3012_v43, 8 }
 0x212   : > { %3061 = vxpose.xlu1.b32.cont [11/16] (narrow) %v3013_v31, 8 }
 0x216   : > { %3062 = vxpose.xlu1.b32.cont [12/16] (narrow) %v3014_v56, 8 }
 0x21a   : > { %3063 = vxpose.xlu1.b32.cont [13/16] (narrow) %v3015_v21, 8 }
 0x21e   : > { %3064 = vxpose.xlu1.b32.cont [14/16] (narrow) %v3016_v49, 8 }
 0x222   : > { %3065 = vxpose.xlu1.b32.cont [15/16] (narrow) %v3017_v36, 8 }
 0x226   : > { %3066 = vxpose.xlu1.b32.end [16/16] (narrow) %v3018_v13, 8 }
 0x246   : > { %v3035_v45 = vpop.trf.xlu0 }
 0x247   : > { %3083 = vst [vmem:[%s177_s9] sm:$0xff] %v3035_v45 }
 0x266   : > { %v3067_v60 = vpop.trf.xlu1 }
 0x267   : > { %3084 = vst [vmem:[%s177_s9 + $0x8] sm:$0xff] %v3067_v60 }
 0x268   : > { %4303 = shalt.err (!%p4300_p5)
}
 0x269   : > { %s4304_s29 = scalar_lea.hbm %s3100_s21, 256  ;;  %s4308_s5 = scalar_lea.hbm %s6058_s3, 512 }
 0x26a   : > { %p4305_p6 = scmp.ne.s32.totalorder %s3100_s21, %s4304_s29  ;;  %p4309_p10 = scmp.lt.s32.totalorder %s3100_s21, %s6058_s3 }
 0x26b   : > { %p4310_p11 = scmp.lt.s32.totalorder %s4308_s5, %s4304_s29 }
 0x26c   : > { %p4306_p7 = pnand %p4305_p6, %p4429_p4 }
 0x26d   : > { %p4311_p12 = por %p4310_p11, %p4309_p10 }
 0x26e   : > { %p4307_p9 = pneg %p4306_p7 }
 0x270   : > { %p4312_p13 = pnand %p4311_p12, %p4307_p9 }
 0x272   : > { %4315 = shalt.err (!%p4312_p13)
}
 0x273   : > { %4235 = dma.vmem_to_hbm [thread:$0]  (%p4429_p4), %s6012_s10, 256, %s3100_s21, %s3086_s23  }
 0x274 PF: > { %p4241_p0 = scmp.ge.s32.totalorder %s4366_s17, 2  ;;  %s3114_s8 = sand.u32 1, %s4346_s12  }
 0x275   : > { %s3115_s9 = scalar_lea.sflag [#allocation3], %s3114_s8 }
 0x276   : > { %p4238_p1 = pnand %p4241_p0, %p4436_p8 }
 0x278   : > { %p4239_p2 = pneg %p4238_p1 }
 0x27a   : > { %4341 = dma.done.wait (%p4239_p2), %s3115_s9, 256  }
 0x27b   : > { %4343 = vsyncadd (%p4239_p2), %s3115_s9, 4294967040  ;;  %s16_s17 = sadd.s32 1, %s4366_s17   ;;  %s6271_s12 = smov %s4350_s13 }
 0x27c   : > { %p13_p3 = scmp.ge.s32.totalorder %s16_s17, 4   ;;  %s6272_s13 = smov %s4354_s14 }
 0x27d   : > { %s6273_s14 = smov %s4442_s25  ;;  %s6274_s15 = smov %s4362_s16 }
 0x27e   : > { %s6275_s16 = smov %s6277_s20  ;;  %15 = sbr.rel (!%p13_p3) target bundleno = 4 (0x4), region = 68 }
 0x283   :  { %3120 = vsyncpa [#allocation3], 1 }
 0x284   :  { %3122 = vsyncpa [#allocation3 + $0x1], 1 }

</bundles_post_ra>
